<compile_context>
chip_gen: v6e
topology: v6e:2x2x1
jax: 0.10.0
libtpu: 0.0.40
codegen_flags: <defaults>
</compile_context>

<pallas_src>
import functools

import numpy as np
import jax
import jax.numpy as jnp
from jax.experimental import pallas as pl
from jax.experimental.pallas import tpu as pltpu


# --------------------------------------------------------------------------
# Pallas kernel: one batch group (Bg batch elements folded into lanes) per
# grid step.  Weights are shared (constant index maps) across all steps.
# --------------------------------------------------------------------------
def _encoder_kernel(g_ref, aux_ref, at_ref, wgb_ref, wnb_ref, wsb_ref,
                    wglb_ref, w1b_ref, w2b_ref, vecs_ref, out_ref, x_ref, *, k):
    hw = g_ref.shape[0]                    # grid nodes
    npad, bh = x_ref.shape                 # padded node count, Bg*hidden
    b64 = w1b_ref.shape[2]                 # Bg*64
    out_l = out_ref.shape[1]               # 128 (lane-dense output width)
    grow = out_ref.shape[0] - 8            # row of the global-feature block
    bf16 = jnp.bfloat16

    # Packed row-vector parameter table (biases + rank-1 weights), f32, static slices.
    V = vecs_ref[...]
    bg, wv, bv = V[0:1, :bh], V[1:2, :bh], V[2:3, :bh]
    wy, by = V[3:4, :bh], V[4:5, :bh]
    wa, ba = V[5:6, :bh], V[6:7, :bh]
    bgl = V[13:14, :out_l]
    b1 = V[14:15, :b64]
    b2 = V[15:16, :out_l]

    aux = aux_ref[...]                     # [AUX_ROWS, Bg*HD] f32
    va_lane = aux[0:k, :]                  # village area, lane-broadcast per batch
    yr_lane = aux[k:k + 1, :]
    ar_lane = aux[k + 1:k + 2, :]

    # ---- node projections written straight into the padded activation slab ----
    gp = jnp.dot(g_ref[...].astype(bf16), wgb_ref[...],
                 preferred_element_type=jnp.float32) + bg        # MXU
    x_ref[0:hw, :] = gp
    x_ref[hw:hw + k, :] = va_lane * wv + bv                      # rank-1, VPU
    if npad > hw + k:                                            # static branch
        x_ref[hw + k:, :] = jnp.zeros((npad - hw - k, bh), jnp.float32)

    at = at_ref[...]                       # [npad, npad] bf16 (integer counts: exact)

    # ---- 3 GraphConv layers, batch folded into lanes, bf16 MXU operands -------
    # Pad rows of x never leak into valid rows: AT's pad columns are zero.
    # TODO(synk): replace the dense AT @ msgs aggregation with an 8-neighbor
    # pltpu.roll stencil (plus skinny village<->grid matmuls) before scaling
    # H*W -- dense [N,N] adjacency will not fit VMEM at realistic grid sizes.
    for l in range(3):
        xb = x_ref[...].astype(bf16)
        msgs = (jnp.dot(xb, wnb_ref[l], preferred_element_type=jnp.float32)
                + V[7 + l:8 + l, :bh])
        agg = jnp.dot(at, msgs.astype(bf16), preferred_element_type=jnp.float32)
        out = (jnp.dot(xb, wsb_ref[l], preferred_element_type=jnp.float32)
               + V[10 + l:11 + l, :bh] + agg)
        x_ref[...] = jnp.maximum(out, 0.0)

    x = x_ref[...]

    # ---- global branch ---------------------------------------------------------
    grid_pool = jnp.mean(x[0:hw, :], axis=0, keepdims=True)      # [1, Bg*HD]
    ye = jnp.maximum(yr_lane * wy + by, 0.0)
    ae = jnp.maximum(ar_lane * wa + ba, 0.0)
    gp_b, ye_b, ae_b = grid_pool.astype(bf16), ye.astype(bf16), ae.astype(bf16)
    gl = (jnp.dot(gp_b, wglb_ref[0], preferred_element_type=jnp.float32)
          + jnp.dot(ye_b, wglb_ref[1], preferred_element_type=jnp.float32)
          + jnp.dot(ae_b, wglb_ref[2], preferred_element_type=jnp.float32)
          + bgl)                                                 # [1, 128] lane-dense

    # ---- village branch --------------------------------------------------------
    vn = x[hw:hw + k, :].astype(bf16)
    h1 = (jnp.dot(vn, w1b_ref[0], preferred_element_type=jnp.float32)
          + jnp.dot(ye_b, w1b_ref[1], preferred_element_type=jnp.float32)
          + jnp.dot(ae_b, w1b_ref[2], preferred_element_type=jnp.float32)
          + b1)
    h1 = jnp.maximum(h1, 0.0)
    vmid = (jnp.dot(h1.astype(bf16), w2b_ref[...],
                    preferred_element_type=jnp.float32) + b2)    # [K, 128] lane-dense

    # ---- fused lane-dense output slab ------------------------------------------
    # rows [0:K] = village mid features, row `grow` = global features; remaining
    # pad rows are never read by the host.
    out_ref[0:k, :] = vmid
    out_ref[grow:grow + 1, :] = jnp.maximum(gl, 0.0)


# --------------------------------------------------------------------------
# Host-side one-time parameter folding: block-diagonal bf16 weights (lanes
# padded to 128 for the output-producing matmuls) + packed f32 bias table.
# --------------------------------------------------------------------------
def _block_diag(w, n):
    din, dout = w.shape
    eye = jnp.eye(n, dtype=w.dtype)
    return (eye[:, None, :, None] * w[None, :, None, :]).reshape(n * din, n * dout)


def fold_params(p, group_size):
    Bg = group_size
    HD = p['Wg'].shape[1]
    GD = p['Wgl'].shape[1]
    V1 = p['W2'].shape[1]
    LANE = 128

    def rup(n, m):
        return ((n + m - 1) // m) * m

    out_lanes = max(rup(Bg * GD, LANE), rup(Bg * V1, LANE))

    def tile_row(v):
        return jnp.tile(v.reshape(1, -1), (1, Bg))

    rows = [tile_row(p['bg']),
            tile_row(p['Wv']), tile_row(p['bv']),
            tile_row(p['Wy']), tile_row(p['by']),
            tile_row(p['Wa']), tile_row(p['ba']),
            tile_row(p['bn'][0]), tile_row(p['bn'][1]), tile_row(p['bn'][2]),
            tile_row(p['bs'][0]), tile_row(p['bs'][1]), tile_row(p['bs'][2]),
            tile_row(p['bgl']),
            tile_row(p['b1']),
            tile_row(p['b2'])]
    vw = rup(max(max(int(r.size) for r in rows), out_lanes), LANE)
    vecs = jnp.stack([jnp.pad(r.reshape(-1), (0, vw - int(r.size))) for r in rows])

    def bd(w):
        return _block_diag(w, Bg)

    def pad_cols(w, n):
        return jnp.pad(w, ((0, 0), (0, n - w.shape[1])))

    bf = jnp.bfloat16
    return {
        'WgB': bd(p['Wg']).astype(bf),
        'WnB': jnp.stack([bd(p['Wn'][l]) for l in range(3)]).astype(bf),
        'WsB': jnp.stack([bd(p['Ws'][l]) for l in range(3)]).astype(bf),
        'WglB': jnp.stack([pad_cols(bd(p['Wgl'][i * HD:(i + 1) * HD]), out_lanes)
                           for i in range(3)]).astype(bf),
        'W1B': jnp.stack([bd(p['W1'][i * HD:(i + 1) * HD]) for i in range(3)]).astype(bf),
        'W2B': pad_cols(bd(p['W2']), out_lanes).astype(bf),
        'vecs': vecs.astype(jnp.float32),
        'group_size': Bg, 'hd': HD, 'gd': GD, 'v1': V1, 'out_lanes': out_lanes,
    }


# --------------------------------------------------------------------------
# Adjacency (transposed): AT[dst, src] = #edges src->dst, shared by the whole
# batch (village coords are fixed from batch 0, matching the module's cache).
# --------------------------------------------------------------------------
def build_adjacency_transpose(H, W, K, coords):
    HW = H * W
    N = HW + K
    rows, cols = [], []
    for i in range(H):
        for j in range(W):
            src = i * W + j
            for di in (-1, 0, 1):
                for dj in (-1, 0, 1):
                    if di == 0 and dj == 0:
                        continue
                    ni, nj = i + di, j + dj
                    if 0 <= ni < H and 0 <= nj < W:
                        rows.append(src)
                        cols.append(ni * W + nj)
    for k in range(K):
        gi = int(coords[k, 0]) * W + int(coords[k, 1])
        vi = HW + k
        rows += [gi, vi]
        cols += [vi, gi]
    at = np.zeros((N, N), np.float32)
    np.add.at(at, (np.asarray(cols), np.asarray(rows)), 1.0)
    return jnp.asarray(at)


# --------------------------------------------------------------------------
# Host-side wrapper: fold batch groups into lanes, call the kernel over a
# "parallel" group grid, unfold the fused output.
# --------------------------------------------------------------------------
def feature_encoder_gnn(grid_input, village_data, year, area_so_far, at_pad, fp):
    Bg = fp['group_size']
    HD, GD, V1, OUT_L = fp['hd'], fp['gd'], fp['v1'], fp['out_lanes']
    B, C, H, W = grid_input.shape
    K = village_data.shape[1]
    HW = H * W
    assert B % Bg == 0, "batch must be a multiple of the lane-fold group size"
    G = B // Bg
    BH = Bg * HD
    N_pad = at_pad.shape[0]

    AUX_ROWS = ((K + 2 + 7) // 8) * 8
    OUT_ROWS = ((K + 7) // 8) * 8 + 8
    GROW = OUT_ROWS - 8

    year = year.reshape(B).astype(jnp.float32)
    area_so_far = area_so_far.reshape(B).astype(jnp.float32)

    # batch-folded, node-major inputs (batch folded into lanes, batch-major)
    g2 = (grid_input.astype(jnp.float32)
          .reshape(G, Bg, C, HW).transpose(0, 3, 1, 2).reshape(G * HW, Bg * C))

    va = village_data[..., 2].astype(jnp.float32).reshape(G, Bg, K)
    va_lane = jnp.broadcast_to(va.transpose(0, 2, 1)[..., None],
                               (G, K, Bg, HD)).reshape(G, K, BH)
    yr_lane = jnp.broadcast_to(year.reshape(G, Bg, 1), (G, Bg, HD)).reshape(G, 1, BH)
    ar_lane = jnp.broadcast_to(area_so_far.reshape(G, Bg, 1),
                               (G, Bg, HD)).reshape(G, 1, BH)
    pad = jnp.zeros((G, AUX_ROWS - (K + 2), BH), jnp.float32)
    aux = jnp.concatenate([va_lane, yr_lane, ar_lane, pad],
                          axis=1).reshape(G * AUX_ROWS, BH)

    kern = functools.partial(_encoder_kernel, k=K)
    out = pl.pallas_call(
        kern,
        out_shape=jax.ShapeDtypeStruct((G * OUT_ROWS, OUT_L), jnp.float32),
        grid_spec=pltpu.PrefetchScalarGridSpec(
            num_scalar_prefetch=0,
            grid=(G,),
            in_specs=[
                pl.BlockSpec((HW, Bg * C), lambda i: (i, 0)),        # per-group
                pl.BlockSpec((AUX_ROWS, BH), lambda i: (i, 0)),      # per-group
                pl.BlockSpec(at_pad.shape, lambda i: (0, 0)),        # resident
                pl.BlockSpec(fp['WgB'].shape, lambda i: (0, 0)),     # resident
                pl.BlockSpec(fp['WnB'].shape, lambda i: (0, 0, 0)),  # resident
                pl.BlockSpec(fp['WsB'].shape, lambda i: (0, 0, 0)),  # resident
                pl.BlockSpec(fp['WglB'].shape, lambda i: (0, 0, 0)), # resident
                pl.BlockSpec(fp['W1B'].shape, lambda i: (0, 0, 0)),  # resident
                pl.BlockSpec(fp['W2B'].shape, lambda i: (0, 0)),     # resident
                pl.BlockSpec(fp['vecs'].shape, lambda i: (0, 0)),    # resident
            ],
            out_specs=pl.BlockSpec((OUT_ROWS, OUT_L), lambda i: (i, 0)),
            scratch_shapes=[pltpu.VMEM((N_pad, BH), jnp.float32)],
        ),
        compiler_params=pltpu.CompilerParams(
            dimension_semantics=("parallel",)),
    )(g2, aux, at_pad, fp['WgB'], fp['WnB'], fp['WsB'],
      fp['WglB'], fp['W1B'], fp['W2B'], fp['vecs'])

    out = out.reshape(G, OUT_ROWS, OUT_L)
    vmid = (out[:, :K, :Bg * V1].reshape(G, K, Bg, V1)
            .transpose(0, 2, 1, 3).reshape(B, K, V1))
    gfeat = out[:, GROW, :Bg * GD].reshape(B, GD)
    # pass-through of the raw village area appended on the host (free XLA fusion)
    vfeats = jnp.concatenate([vmid, village_data[..., 2:3].astype(jnp.float32)],
                             axis=-1)
    return vfeats, gfeat


# --------------------------------------------------------------------------
# Pure-JAX f32 reference (same math as the PyTorch module) for verification.
# --------------------------------------------------------------------------
def reference(grid_input, village_data, year, area_so_far, at, p):
    B, C, H, W = grid_input.shape
    K = village_data.shape[1]
    HW = H * W
    g = grid_input.reshape(B, C, HW).transpose(0, 2, 1)
    gp = g @ p['Wg'] + p['bg']
    vp = village_data[..., 2:3] @ p['Wv'] + p['bv']
    x = jnp.concatenate([gp, vp], axis=1)
    for l in range(3):
        msgs = x @ p['Wn'][l] + p['bn'][l]
        agg = jnp.einsum('ij,bjh->bih', at, msgs)
        x = jax.nn.relu(x @ p['Ws'][l] + p['bs'][l] + agg)
    grid_pool = x[:, :HW].mean(axis=1)
    ye = jax.nn.relu(year[:, None] @ p['Wy'] + p['by'])
    ae = jax.nn.relu(area_so_far[:, None] @ p['Wa'] + p['ba'])
    gl_in = jnp.concatenate([grid_pool, ye, ae], axis=-1)
    gfeat = jax.nn.relu(gl_in @ p['Wgl'] + p['bgl'])
    vn = x[:, HW:]
    ye_v = jnp.broadcast_to(ye[:, None, :], (B, K, ye.shape[-1]))
    ae_v = jnp.broadcast_to(ae[:, None, :], (B, K, ae.shape[-1]))
    v_in = jnp.concatenate([vn, ye_v, ae_v], axis=-1)
    vmid = jax.nn.relu(v_in @ p['W1'] + p['b1']) @ p['W2'] + p['b2']
    vfeats = jnp.concatenate([vmid, village_data[..., 2:3]], axis=-1)
    return vfeats, gfeat


# --------------------------------------------------------------------------
if __name__ == "__main__":
    # Small config consistent with the module.  GROUP=4 folds 4 batches into
    # 128 lanes (fills the v5e 128x128 MXU); use GROUP=8 on v6e/v7x to fill
    # their 256-wide MXU.  B=8 gives a 2-step "parallel" group grid.
    B, C, H, W, K = 8, 4, 8, 8, 8          # in_channels=4, grid 8x8, 8 villages
    HD, GD, VD = 32, 16, 8                 # hidden, global_feature_dim, village_feature_dim
    GROUP = 4

    key = jax.random.PRNGKey(0)
    ks = jax.random.split(key, 24)

    def init(k_, shape, scale=0.1):
        return scale * jax.random.normal(k_, shape, jnp.float32)

    params = {
        'Wg': init(ks[0], (C, HD)),      'bg': init(ks[1], (1, HD)),
        'Wv': init(ks[2], (1, HD)),      'bv': init(ks[3], (1, HD)),
        'Wn': init(ks[4], (3, HD, HD)),  'bn': init(ks[5], (3, 1, HD)),
        'Ws': init(ks[6], (3, HD, HD)),  'bs': init(ks[7], (3, 1, HD)),
        'Wy': init(ks[8], (1, HD)),      'by': init(ks[9], (1, HD)),
        'Wa': init(ks[10], (1, HD)),     'ba': init(ks[11], (1, HD)),
        'Wgl': init(ks[12], (3 * HD, GD)), 'bgl': init(ks[13], (1, GD)),
        'W1': init(ks[14], (3 * HD, 64)),  'b1': init(ks[15], (1, 64)),
        'W2': init(ks[16], (64, VD - 1)),  'b2': init(ks[17], (1, VD - 1)),
    }

    grid_input = jax.random.normal(ks[18], (B, C, H, W), jnp.float32)
    coords_r = jax.random.randint(ks[19], (K,), 0, H)
    coords_c = jax.random.randint(ks[20], (K,), 0, W)
    areas = jax.random.uniform(ks[21], (B, K), jnp.float32)
    village_data = jnp.stack(
        [jnp.broadcast_to(coords_r.astype(jnp.float32), (B, K)),
         jnp.broadcast_to(coords_c.astype(jnp.float32), (B, K)),
         areas], axis=-1)                                   # [B, K, 3]
    year = jax.random.uniform(ks[22], (B,), jnp.float32) * 10.0
    area_so_far = jax.random.uniform(ks[23], (B,), jnp.float32) * 5.0

    # Module caches edge_index from batch-0 village coords.
    coords_np = np.asarray(village_data[0, :, :2]).astype(np.int64)
    at = build_adjacency_transpose(H, W, K, coords_np)       # [N, N] f32
    N = H * W + K
    N_pad = ((N + 127) // 128) * 128
    at_pad = (jnp.zeros((N_pad, N_pad), jnp.float32)
              .at[:N, :N].set(at).astype(jnp.bfloat16))      # lane-dense, exact counts

    fp = fold_params(params, GROUP)                          # one-time host fold

    vfeats, gfeats = feature_encoder_gnn(grid_input, village_data, year,
                                         area_so_far, at_pad, fp)
    jax.block_until_ready((vfeats, gfeats))

    vref, gref = reference(grid_input, village_data, year, area_so_far, at, params)
    # bf16 MXU operands vs. the exact-f32 reference accumulate ~1e-2-level
    # differences through 3 GraphConv layers -> loosened tolerance.
    np.testing.assert_allclose(np.asarray(vfeats), np.asarray(vref), rtol=1e-1, atol=1e-1)
    np.testing.assert_allclose(np.asarray(gfeats), np.asarray(gref), rtol=1e-1, atol=1e-1)

    assert vfeats.shape == (B, K, VD) and gfeats.shape == (B, GD)
    print("KERNEL_OK")
</pallas_src>

<mosaic_0001>
module attributes {stable_mosaic.version = 11 : i64} {
  func.func @_encoder_kernel(%arg0: i32, %arg1: memref<64x16xf32, #tpu.memory_space<vmem>>, %arg2: memref<16x128xf32, #tpu.memory_space<vmem>>, %arg3: memref<128x128xbf16, #tpu.memory_space<vmem>>, %arg4: memref<16x128xbf16, #tpu.memory_space<vmem>>, %arg5: memref<3x128x128xbf16, #tpu.memory_space<vmem>>, %arg6: memref<3x128x128xbf16, #tpu.memory_space<vmem>>, %arg7: memref<3x128x128xbf16, #tpu.memory_space<vmem>>, %arg8: memref<3x128x256xbf16, #tpu.memory_space<vmem>>, %arg9: memref<256x128xbf16, #tpu.memory_space<vmem>>, %arg10: memref<16x256xf32, #tpu.memory_space<vmem>>, %arg11: memref<16x128xf32, #tpu.memory_space<vmem>>, %arg12: memref<128x128xf32, #tpu.memory_space<vmem>>) attributes {dimension_semantics = [#tpu.dimension_semantics<parallel>], iteration_bounds = array<i64: 2>, scalar_prefetch = 0 : i64, scratch_operands = 1 : i64, tpu.core_type = #tpu.core_type<tc>, window_params = [{transform_indices = @transform_0, window_bounds = array<i64: 64, 16>}, {transform_indices = @transform_1, window_bounds = array<i64: 16, 128>}, {pipeline_mode = #tpu.pipeline_mode<synchronous>, transform_indices = @transform_2, window_bounds = array<i64: 128, 128>}, {pipeline_mode = #tpu.pipeline_mode<synchronous>, transform_indices = @transform_3, window_bounds = array<i64: 16, 128>}, {pipeline_mode = #tpu.pipeline_mode<synchronous>, transform_indices = @transform_4, window_bounds = array<i64: 3, 128, 128>}, {pipeline_mode = #tpu.pipeline_mode<synchronous>, transform_indices = @transform_5, window_bounds = array<i64: 3, 128, 128>}, {pipeline_mode = #tpu.pipeline_mode<synchronous>, transform_indices = @transform_6, window_bounds = array<i64: 3, 128, 128>}, {pipeline_mode = #tpu.pipeline_mode<synchronous>, transform_indices = @transform_7, window_bounds = array<i64: 3, 128, 256>}, {pipeline_mode = #tpu.pipeline_mode<synchronous>, transform_indices = @transform_8, window_bounds = array<i64: 256, 128>}, {pipeline_mode = #tpu.pipeline_mode<synchronous>, transform_indices = @transform_9, window_bounds = array<i64: 16, 256>}, {transform_indices = @transform_10, window_bounds = array<i64: 16, 128>}]} {
    %c0 = arith.constant 0 : index
    %c0_0 = arith.constant 0 : index
    %0 = vector.load %arg10[%c0, %c0_0] : memref<16x256xf32, #tpu.memory_space<vmem>>, vector<16x256xf32>
    %1 = vector.extract_strided_slice %0 {offsets = [0, 0], sizes = [1, 128], strides = [1, 1]} : vector<16x256xf32> to vector<1x128xf32>
    %2 = vector.extract_strided_slice %0 {offsets = [1, 0], sizes = [1, 128], strides = [1, 1]} : vector<16x256xf32> to vector<1x128xf32>
    %3 = vector.extract_strided_slice %0 {offsets = [2, 0], sizes = [1, 128], strides = [1, 1]} : vector<16x256xf32> to vector<1x128xf32>
    %4 = vector.extract_strided_slice %0 {offsets = [3, 0], sizes = [1, 128], strides = [1, 1]} : vector<16x256xf32> to vector<1x128xf32>
    %5 = vector.extract_strided_slice %0 {offsets = [4, 0], sizes = [1, 128], strides = [1, 1]} : vector<16x256xf32> to vector<1x128xf32>
    %6 = vector.extract_strided_slice %0 {offsets = [5, 0], sizes = [1, 128], strides = [1, 1]} : vector<16x256xf32> to vector<1x128xf32>
    %7 = vector.extract_strided_slice %0 {offsets = [6, 0], sizes = [1, 128], strides = [1, 1]} : vector<16x256xf32> to vector<1x128xf32>
    %8 = vector.extract_strided_slice %0 {offsets = [13, 0], sizes = [1, 128], strides = [1, 1]} : vector<16x256xf32> to vector<1x128xf32>
    %9 = vector.extract_strided_slice %0 {offsets = [14, 0], sizes = [1, 256], strides = [1, 1]} : vector<16x256xf32> to vector<1x256xf32>
    %10 = vector.extract_strided_slice %0 {offsets = [15, 0], sizes = [1, 128], strides = [1, 1]} : vector<16x256xf32> to vector<1x128xf32>
    %c0_1 = arith.constant 0 : index
    %c0_2 = arith.constant 0 : index
    %11 = vector.load %arg2[%c0_1, %c0_2] : memref<16x128xf32, #tpu.memory_space<vmem>>, vector<16x128xf32>
    %12 = vector.extract_strided_slice %11 {offsets = [0, 0], sizes = [8, 128], strides = [1, 1]} : vector<16x128xf32> to vector<8x128xf32>
    %13 = vector.extract_strided_slice %11 {offsets = [8, 0], sizes = [1, 128], strides = [1, 1]} : vector<16x128xf32> to vector<1x128xf32>
    %14 = vector.extract_strided_slice %11 {offsets = [9, 0], sizes = [1, 128], strides = [1, 1]} : vector<16x128xf32> to vector<1x128xf32>
    %c0_3 = arith.constant 0 : index
    %c0_4 = arith.constant 0 : index
    %15 = vector.load %arg1[%c0_3, %c0_4] : memref<64x16xf32, #tpu.memory_space<vmem>>, vector<64x16xf32>
    %16 = arith.truncf %15 : vector<64x16xf32> to vector<64x16xbf16>
    %c0_5 = arith.constant 0 : index
    %c0_6 = arith.constant 0 : index
    %17 = vector.load %arg4[%c0_5, %c0_6] : memref<16x128xbf16, #tpu.memory_space<vmem>>, vector<16x128xbf16>
    %cst = arith.constant dense<0.000000e+00> : vector<64x128xf32>
    %18 = tpu.matmul %16, %17, %cst {dimension_numbers = #tpu.dot_dimension_numbers<[1], [0], [0], [1], [0, 0, 1, 1], [], []>} : vector<64x16xbf16>, vector<16x128xbf16>, vector<64x128xf32> -> vector<64x128xf32>
    %19 = vector.broadcast %1 : vector<1x128xf32> to vector<64x128xf32>
    %20 = arith.addf %18, %19 : vector<64x128xf32>
    %c0_7 = arith.constant 0 : index
    %c0_8 = arith.constant 0 : index
    %21 = vector.load %arg12[%c0_7, %c0_8] : memref<128x128xf32, #tpu.memory_space<vmem>>, vector<64x128xf32>
    tpu.vector_store %arg12[%c0_7, %c0_8], %20 {strides = array<i32>} : memref<128x128xf32, #tpu.memory_space<vmem>>, vector<64x128xf32>,
    %22 = vector.broadcast %2 : vector<1x128xf32> to vector<8x128xf32>
    %23 = arith.mulf %12, %22 : vector<8x128xf32>
    %24 = vector.broadcast %3 : vector<1x128xf32> to vector<8x128xf32>
    %25 = arith.addf %23, %24 : vector<8x128xf32>
    %c64 = arith.constant 64 : index
    %c0_9 = arith.constant 0 : index
    %26 = vector.load %arg12[%c64, %c0_9] : memref<128x128xf32, #tpu.memory_space<vmem>>, vector<8x128xf32>
    tpu.vector_store %arg12[%c64, %c0_9], %25 {strides = array<i32>} : memref<128x128xf32, #tpu.memory_space<vmem>>, vector<8x128xf32>,
    %cst_10 = arith.constant 0.000000e+00 : f32
    %27 = vector.broadcast %cst_10 : f32 to vector<56x128xf32>
    %c72 = arith.constant 72 : index
    %c0_11 = arith.constant 0 : index
    %28 = vector.load %arg12[%c72, %c0_11] : memref<128x128xf32, #tpu.memory_space<vmem>>, vector<56x128xf32>
    tpu.vector_store %arg12[%c72, %c0_11], %27 {strides = array<i32>} : memref<128x128xf32, #tpu.memory_space<vmem>>, vector<56x128xf32>,
    %c0_12 = arith.constant 0 : index
    %c0_13 = arith.constant 0 : index
    %29 = vector.load %arg3[%c0_12, %c0_13] : memref<128x128xbf16, #tpu.memory_space<vmem>>, vector<128x128xbf16>
    %c0_14 = arith.constant 0 : index
    %c0_15 = arith.constant 0 : index
    %30 = vector.load %arg12[%c0_14, %c0_15] : memref<128x128xf32, #tpu.memory_space<vmem>>, vector<128x128xf32>
    %31 = arith.truncf %30 : vector<128x128xf32> to vector<128x128xbf16>
    %c0_16 = arith.constant 0 : index
    %c0_17 = arith.constant 0 : index
    %c0_18 = arith.constant 0 : index
    %32 = vector.load %arg5[%c0_16, %c0_17, %c0_18] : memref<3x128x128xbf16, #tpu.memory_space<vmem>>, vector<1x128x128xbf16>
    %33 = vector.shape_cast %32 : vector<1x128x128xbf16> to vector<128x128xbf16>
    %cst_19 = arith.constant dense<0.000000e+00> : vector<128x128xf32>
    %34 = tpu.matmul %31, %33, %cst_19 {dimension_numbers = #tpu.dot_dimension_numbers<[1], [0], [0], [1], [0, 0, 1, 1], [], []>} : vector<128x128xbf16>, vector<128x128xbf16>, vector<128x128xf32> -> vector<128x128xf32>
    %35 = vector.extract_strided_slice %0 {offsets = [7, 0], sizes = [1, 128], strides = [1, 1]} : vector<16x256xf32> to vector<1x128xf32>
    %36 = vector.broadcast %35 : vector<1x128xf32> to vector<128x128xf32>
    %37 = arith.addf %34, %36 : vector<128x128xf32>
    %38 = arith.truncf %37 : vector<128x128xf32> to vector<128x128xbf16>
    %cst_20 = arith.constant dense<0.000000e+00> : vector<128x128xf32>
    %39 = tpu.matmul %29, %38, %cst_20 {dimension_numbers = #tpu.dot_dimension_numbers<[1], [0], [0], [1], [0, 0, 1, 1], [], []>} : vector<128x128xbf16>, vector<128x128xbf16>, vector<128x128xf32> -> vector<128x128xf32>
    %c0_21 = arith.constant 0 : index
    %c0_22 = arith.constant 0 : index
    %c0_23 = arith.constant 0 : index
    %40 = vector.load %arg6[%c0_21, %c0_22, %c0_23] : memref<3x128x128xbf16, #tpu.memory_space<vmem>>, vector<1x128x128xbf16>
    %41 = vector.shape_cast %40 : vector<1x128x128xbf16> to vector<128x128xbf16>
    %cst_24 = arith.constant dense<0.000000e+00> : vector<128x128xf32>
    %42 = tpu.matmul %31, %41, %cst_24 {dimension_numbers = #tpu.dot_dimension_numbers<[1], [0], [0], [1], [0, 0, 1, 1], [], []>} : vector<128x128xbf16>, vector<128x128xbf16>, vector<128x128xf32> -> vector<128x128xf32>
    %43 = vector.extract_strided_slice %0 {offsets = [10, 0], sizes = [1, 128], strides = [1, 1]} : vector<16x256xf32> to vector<1x128xf32>
    %44 = vector.broadcast %43 : vector<1x128xf32> to vector<128x128xf32>
    %45 = arith.addf %42, %44 : vector<128x128xf32>
    %46 = arith.addf %45, %39 : vector<128x128xf32>
    %cst_25 = arith.constant 0.000000e+00 : f32
    %47 = vector.broadcast %cst_25 : f32 to vector<128x128xf32>
    %48 = arith.maximumf %46, %47 : vector<128x128xf32>
    %c0_26 = arith.constant 0 : index
    %c0_27 = arith.constant 0 : index
    %49 = vector.load %arg12[%c0_26, %c0_27] : memref<128x128xf32, #tpu.memory_space<vmem>>, vector<128x128xf32>
    tpu.vector_store %arg12[%c0_26, %c0_27], %48 {strides = array<i32>} : memref<128x128xf32, #tpu.memory_space<vmem>>, vector<128x128xf32>,
    %c0_28 = arith.constant 0 : index
    %c0_29 = arith.constant 0 : index
    %50 = vector.load %arg12[%c0_28, %c0_29] : memref<128x128xf32, #tpu.memory_space<vmem>>, vector<128x128xf32>
    %51 = arith.truncf %50 : vector<128x128xf32> to vector<128x128xbf16>
    %c1 = arith.constant 1 : index
    %c0_30 = arith.constant 0 : index
    %c0_31 = arith.constant 0 : index
    %52 = vector.load %arg5[%c1, %c0_30, %c0_31] : memref<3x128x128xbf16, #tpu.memory_space<vmem>>, vector<1x128x128xbf16>
    %53 = vector.shape_cast %52 : vector<1x128x128xbf16> to vector<128x128xbf16>
    %cst_32 = arith.constant dense<0.000000e+00> : vector<128x128xf32>
    %54 = tpu.matmul %51, %53, %cst_32 {dimension_numbers = #tpu.dot_dimension_numbers<[1], [0], [0], [1], [0, 0, 1, 1], [], []>} : vector<128x128xbf16>, vector<128x128xbf16>, vector<128x128xf32> -> vector<128x128xf32>
    %55 = vector.extract_strided_slice %0 {offsets = [8, 0], sizes = [1, 128], strides = [1, 1]} : vector<16x256xf32> to vector<1x128xf32>
    %56 = vector.broadcast %55 : vector<1x128xf32> to vector<128x128xf32>
    %57 = arith.addf %54, %56 : vector<128x128xf32>
    %58 = arith.truncf %57 : vector<128x128xf32> to vector<128x128xbf16>
    %cst_33 = arith.constant dense<0.000000e+00> : vector<128x128xf32>
    %59 = tpu.matmul %29, %58, %cst_33 {dimension_numbers = #tpu.dot_dimension_numbers<[1], [0], [0], [1], [0, 0, 1, 1], [], []>} : vector<128x128xbf16>, vector<128x128xbf16>, vector<128x128xf32> -> vector<128x128xf32>
    %c1_34 = arith.constant 1 : index
    %c0_35 = arith.constant 0 : index
    %c0_36 = arith.constant 0 : index
    %60 = vector.load %arg6[%c1_34, %c0_35, %c0_36] : memref<3x128x128xbf16, #tpu.memory_space<vmem>>, vector<1x128x128xbf16>
    %61 = vector.shape_cast %60 : vector<1x128x128xbf16> to vector<128x128xbf16>
    %cst_37 = arith.constant dense<0.000000e+00> : vector<128x128xf32>
    %62 = tpu.matmul %51, %61, %cst_37 {dimension_numbers = #tpu.dot_dimension_numbers<[1], [0], [0], [1], [0, 0, 1, 1], [], []>} : vector<128x128xbf16>, vector<128x128xbf16>, vector<128x128xf32> -> vector<128x128xf32>
    %63 = vector.extract_strided_slice %0 {offsets = [11, 0], sizes = [1, 128], strides = [1, 1]} : vector<16x256xf32> to vector<1x128xf32>
    %64 = vector.broadcast %63 : vector<1x128xf32> to vector<128x128xf32>
    %65 = arith.addf %62, %64 : vector<128x128xf32>
    %66 = arith.addf %65, %59 : vector<128x128xf32>
    %cst_38 = arith.constant 0.000000e+00 : f32
    %67 = vector.broadcast %cst_38 : f32 to vector<128x128xf32>
    %68 = arith.maximumf %66, %67 : vector<128x128xf32>
    %c0_39 = arith.constant 0 : index
    %c0_40 = arith.constant 0 : index
    %69 = vector.load %arg12[%c0_39, %c0_40] : memref<128x128xf32, #tpu.memory_space<vmem>>, vector<128x128xf32>
    tpu.vector_store %arg12[%c0_39, %c0_40], %68 {strides = array<i32>} : memref<128x128xf32, #tpu.memory_space<vmem>>, vector<128x128xf32>,
    %c0_41 = arith.constant 0 : index
    %c0_42 = arith.constant 0 : index
    %70 = vector.load %arg12[%c0_41, %c0_42] : memref<128x128xf32, #tpu.memory_space<vmem>>, vector<128x128xf32>
    %71 = arith.truncf %70 : vector<128x128xf32> to vector<128x128xbf16>
    %c2 = arith.constant 2 : index
    %c0_43 = arith.constant 0 : index
    %c0_44 = arith.constant 0 : index
    %72 = vector.load %arg5[%c2, %c0_43, %c0_44] : memref<3x128x128xbf16, #tpu.memory_space<vmem>>, vector<1x128x128xbf16>
    %73 = vector.shape_cast %72 : vector<1x128x128xbf16> to vector<128x128xbf16>
    %cst_45 = arith.constant dense<0.000000e+00> : vector<128x128xf32>
    %74 = tpu.matmul %71, %73, %cst_45 {dimension_numbers = #tpu.dot_dimension_numbers<[1], [0], [0], [1], [0, 0, 1, 1], [], []>} : vector<128x128xbf16>, vector<128x128xbf16>, vector<128x128xf32> -> vector<128x128xf32>
    %75 = vector.extract_strided_slice %0 {offsets = [9, 0], sizes = [1, 128], strides = [1, 1]} : vector<16x256xf32> to vector<1x128xf32>
    %76 = vector.broadcast %75 : vector<1x128xf32> to vector<128x128xf32>
    %77 = arith.addf %74, %76 : vector<128x128xf32>
    %78 = arith.truncf %77 : vector<128x128xf32> to vector<128x128xbf16>
    %cst_46 = arith.constant dense<0.000000e+00> : vector<128x128xf32>
    %79 = tpu.matmul %29, %78, %cst_46 {dimension_numbers = #tpu.dot_dimension_numbers<[1], [0], [0], [1], [0, 0, 1, 1], [], []>} : vector<128x128xbf16>, vector<128x128xbf16>, vector<128x128xf32> -> vector<128x128xf32>
    %c2_47 = arith.constant 2 : index
    %c0_48 = arith.constant 0 : index
    %c0_49 = arith.constant 0 : index
    %80 = vector.load %arg6[%c2_47, %c0_48, %c0_49] : memref<3x128x128xbf16, #tpu.memory_space<vmem>>, vector<1x128x128xbf16>
    %81 = vector.shape_cast %80 : vector<1x128x128xbf16> to vector<128x128xbf16>
    %cst_50 = arith.constant dense<0.000000e+00> : vector<128x128xf32>
    %82 = tpu.matmul %71, %81, %cst_50 {dimension_numbers = #tpu.dot_dimension_numbers<[1], [0], [0], [1], [0, 0, 1, 1], [], []>} : vector<128x128xbf16>, vector<128x128xbf16>, vector<128x128xf32> -> vector<128x128xf32>
    %83 = vector.extract_strided_slice %0 {offsets = [12, 0], sizes = [1, 128], strides = [1, 1]} : vector<16x256xf32> to vector<1x128xf32>
    %84 = vector.broadcast %83 : vector<1x128xf32> to vector<128x128xf32>
    %85 = arith.addf %82, %84 : vector<128x128xf32>
    %86 = arith.addf %85, %79 : vector<128x128xf32>
    %cst_51 = arith.constant 0.000000e+00 : f32
    %87 = vector.broadcast %cst_51 : f32 to vector<128x128xf32>
    %88 = arith.maximumf %86, %87 : vector<128x128xf32>
    %c0_52 = arith.constant 0 : index
    %c0_53 = arith.constant 0 : index
    %89 = vector.load %arg12[%c0_52, %c0_53] : memref<128x128xf32, #tpu.memory_space<vmem>>, vector<128x128xf32>
    tpu.vector_store %arg12[%c0_52, %c0_53], %88 {strides = array<i32>} : memref<128x128xf32, #tpu.memory_space<vmem>>, vector<128x128xf32>,
    %c0_54 = arith.constant 0 : index
    %c0_55 = arith.constant 0 : index
    %90 = vector.load %arg12[%c0_54, %c0_55] : memref<128x128xf32, #tpu.memory_space<vmem>>, vector<128x128xf32>
    %91 = vector.extract_strided_slice %90 {offsets = [0, 0], sizes = [64, 128], strides = [1, 1]} : vector<128x128xf32> to vector<64x128xf32>
    %cst_56 = arith.constant dense<0.000000e+00> : vector<128xf32>
    %92 = vector.multi_reduction <add>, %91, %cst_56 [0] : vector<64x128xf32> to vector<128xf32>
    %93 = vector.shape_cast %92 : vector<128xf32> to vector<1x128xf32>
    %cst_57 = arith.constant 6.400000e+01 : f32
    %94 = vector.broadcast %cst_57 : f32 to vector<1x128xf32>
    %95 = arith.divf %93, %94 : vector<1x128xf32>
    %96 = arith.mulf %13, %4 : vector<1x128xf32>
    %97 = arith.addf %96, %5 : vector<1x128xf32>
    %cst_58 = arith.constant 0.000000e+00 : f32
    %98 = vector.broadcast %cst_58 : f32 to vector<1x128xf32>
    %99 = arith.maximumf %97, %98 : vector<1x128xf32>
    %100 = arith.mulf %14, %6 : vector<1x128xf32>
    %101 = arith.addf %100, %7 : vector<1x128xf32>
    %cst_59 = arith.constant 0.000000e+00 : f32
    %102 = vector.broadcast %cst_59 : f32 to vector<1x128xf32>
    %103 = arith.maximumf %101, %102 : vector<1x128xf32>
    %104 = arith.truncf %95 : vector<1x128xf32> to vector<1x128xbf16>
    %105 = arith.truncf %99 : vector<1x128xf32> to vector<1x128xbf16>
    %106 = arith.truncf %103 : vector<1x128xf32> to vector<1x128xbf16>
    %c0_60 = arith.constant 0 : index
    %c0_61 = arith.constant 0 : index
    %c0_62 = arith.constant 0 : index
    %107 = vector.load %arg7[%c0_60, %c0_61, %c0_62] : memref<3x128x128xbf16, #tpu.memory_space<vmem>>, vector<1x128x128xbf16>
    %108 = vector.shape_cast %107 : vector<1x128x128xbf16> to vector<128x128xbf16>
    %cst_63 = arith.constant dense<0.000000e+00> : vector<1x128xf32>
    %109 = tpu.matmul %104, %108, %cst_63 {dimension_numbers = #tpu.dot_dimension_numbers<[1], [0], [0], [1], [0, 0, 1, 1], [], []>} : vector<1x128xbf16>, vector<128x128xbf16>, vector<1x128xf32> -> vector<1x128xf32>
    %c1_64 = arith.constant 1 : index
    %c0_65 = arith.constant 0 : index
    %c0_66 = arith.constant 0 : index
    %110 = vector.load %arg7[%c1_64, %c0_65, %c0_66] : memref<3x128x128xbf16, #tpu.memory_space<vmem>>, vector<1x128x128xbf16>
    %111 = vector.shape_cast %110 : vector<1x128x128xbf16> to vector<128x128xbf16>
    %cst_67 = arith.constant dense<0.000000e+00> : vector<1x128xf32>
    %112 = tpu.matmul %105, %111, %cst_67 {dimension_numbers = #tpu.dot_dimension_numbers<[1], [0], [0], [1], [0, 0, 1, 1], [], []>} : vector<1x128xbf16>, vector<128x128xbf16>, vector<1x128xf32> -> vector<1x128xf32>
    %113 = arith.addf %109, %112 : vector<1x128xf32>
    %c2_68 = arith.constant 2 : index
    %c0_69 = arith.constant 0 : index
    %c0_70 = arith.constant 0 : index
    %114 = vector.load %arg7[%c2_68, %c0_69, %c0_70] : memref<3x128x128xbf16, #tpu.memory_space<vmem>>, vector<1x128x128xbf16>
    %115 = vector.shape_cast %114 : vector<1x128x128xbf16> to vector<128x128xbf16>
    %cst_71 = arith.constant dense<0.000000e+00> : vector<1x128xf32>
    %116 = tpu.matmul %106, %115, %cst_71 {dimension_numbers = #tpu.dot_dimension_numbers<[1], [0], [0], [1], [0, 0, 1, 1], [], []>} : vector<1x128xbf16>, vector<128x128xbf16>, vector<1x128xf32> -> vector<1x128xf32>
    %117 = arith.addf %113, %116 : vector<1x128xf32>
    %118 = arith.addf %117, %8 : vector<1x128xf32>
    %119 = vector.extract_strided_slice %90 {offsets = [64, 0], sizes = [8, 128], strides = [1, 1]} : vector<128x128xf32> to vector<8x128xf32>
    %120 = arith.truncf %119 : vector<8x128xf32> to vector<8x128xbf16>
    %c0_72 = arith.constant 0 : index
    %c0_73 = arith.constant 0 : index
    %c0_74 = arith.constant 0 : index
    %121 = vector.load %arg8[%c0_72, %c0_73, %c0_74] : memref<3x128x256xbf16, #tpu.memory_space<vmem>>, vector<1x128x256xbf16>
    %122 = vector.shape_cast %121 : vector<1x128x256xbf16> to vector<128x256xbf16>
    %cst_75 = arith.constant dense<0.000000e+00> : vector<8x256xf32>
    %123 = tpu.matmul %120, %122, %cst_75 {dimension_numbers = #tpu.dot_dimension_numbers<[1], [0], [0], [1], [0, 0, 1, 1], [], []>} : vector<8x128xbf16>, vector<128x256xbf16>, vector<8x256xf32> -> vector<8x256xf32>
    %c1_76 = arith.constant 1 : index
    %c0_77 = arith.constant 0 : index
    %c0_78 = arith.constant 0 : index
    %124 = vector.load %arg8[%c1_76, %c0_77, %c0_78] : memref<3x128x256xbf16, #tpu.memory_space<vmem>>, vector<1x128x256xbf16>
    %125 = vector.shape_cast %124 : vector<1x128x256xbf16> to vector<128x256xbf16>
    %cst_79 = arith.constant dense<0.000000e+00> : vector<1x256xf32>
    %126 = tpu.matmul %105, %125, %cst_79 {dimension_numbers = #tpu.dot_dimension_numbers<[1], [0], [0], [1], [0, 0, 1, 1], [], []>} : vector<1x128xbf16>, vector<128x256xbf16>, vector<1x256xf32> -> vector<1x256xf32>
    %127 = vector.broadcast %126 : vector<1x256xf32> to vector<8x256xf32>
    %128 = arith.addf %123, %127 : vector<8x256xf32>
    %c2_80 = arith.constant 2 : index
    %c0_81 = arith.constant 0 : index
    %c0_82 = arith.constant 0 : index
    %129 = vector.load %arg8[%c2_80, %c0_81, %c0_82] : memref<3x128x256xbf16, #tpu.memory_space<vmem>>, vector<1x128x256xbf16>
    %130 = vector.shape_cast %129 : vector<1x128x256xbf16> to vector<128x256xbf16>
    %cst_83 = arith.constant dense<0.000000e+00> : vector<1x256xf32>
    %131 = tpu.matmul %106, %130, %cst_83 {dimension_numbers = #tpu.dot_dimension_numbers<[1], [0], [0], [1], [0, 0, 1, 1], [], []>} : vector<1x128xbf16>, vector<128x256xbf16>, vector<1x256xf32> -> vector<1x256xf32>
    %132 = vector.broadcast %131 : vector<1x256xf32> to vector<8x256xf32>
    %133 = arith.addf %128, %132 : vector<8x256xf32>
    %134 = vector.broadcast %9 : vector<1x256xf32> to vector<8x256xf32>
    %135 = arith.addf %133, %134 : vector<8x256xf32>
    %cst_84 = arith.constant 0.000000e+00 : f32
    %136 = vector.broadcast %cst_84 : f32 to vector<8x256xf32>
    %137 = arith.maximumf %135, %136 : vector<8x256xf32>
    %138 = arith.truncf %137 : vector<8x256xf32> to vector<8x256xbf16>
    %c0_85 = arith.constant 0 : index
    %c0_86 = arith.constant 0 : index
    %139 = vector.load %arg9[%c0_85, %c0_86] : memref<256x128xbf16, #tpu.memory_space<vmem>>, vector<256x128xbf16>
    %cst_87 = arith.constant dense<0.000000e+00> : vector<8x128xf32>
    %140 = tpu.matmul %138, %139, %cst_87 {dimension_numbers = #tpu.dot_dimension_numbers<[1], [0], [0], [1], [0, 0, 1, 1], [], []>} : vector<8x256xbf16>, vector<256x128xbf16>, vector<8x128xf32> -> vector<8x128xf32>
    %141 = vector.broadcast %10 : vector<1x128xf32> to vector<8x128xf32>
    %142 = arith.addf %140, %141 : vector<8x128xf32>
    %c0_88 = arith.constant 0 : index
    %c0_89 = arith.constant 0 : index
    %143 = vector.load %arg11[%c0_88, %c0_89] : memref<16x128xf32, #tpu.memory_space<vmem>>, vector<8x128xf32>
    tpu.vector_store %arg11[%c0_88, %c0_89], %142 {strides = array<i32>} : memref<16x128xf32, #tpu.memory_space<vmem>>, vector<8x128xf32>,
    %cst_90 = arith.constant 0.000000e+00 : f32
    %144 = vector.broadcast %cst_90 : f32 to vector<1x128xf32>
    %145 = arith.maximumf %118, %144 : vector<1x128xf32>
    %c8 = arith.constant 8 : index
    %c0_91 = arith.constant 0 : index
    %146 = vector.load %arg11[%c8, %c0_91] : memref<16x128xf32, #tpu.memory_space<vmem>>, vector<1x128xf32>
    tpu.vector_store %arg11[%c8, %c0_91], %145 {strides = array<i32>} : memref<16x128xf32, #tpu.memory_space<vmem>>, vector<1x128xf32>,
    return
  }
  func.func @transform_0(%arg0: i32) -> (i32, i32) {
    %c0_i32 = arith.constant 0 : i32
    %c0_i32_0 = arith.constant 0 : i32
    return %arg0, %c0_i32 : i32, i32
  }
  func.func @transform_1(%arg0: i32) -> (i32, i32) {
    %c0_i32 = arith.constant 0 : i32
    %c0_i32_0 = arith.constant 0 : i32
    return %arg0, %c0_i32 : i32, i32
  }
  func.func @transform_2(%arg0: i32) -> (i32, i32) {
    %c0_i32 = arith.constant 0 : i32
    %c0_i32_0 = arith.constant 0 : i32
    %c0_i32_1 = arith.constant 0 : i32
    return %c0_i32, %c0_i32_0 : i32, i32
  }
  func.func @transform_3(%arg0: i32) -> (i32, i32) {
    %c0_i32 = arith.constant 0 : i32
    %c0_i32_0 = arith.constant 0 : i32
    %c0_i32_1 = arith.constant 0 : i32
    return %c0_i32, %c0_i32_0 : i32, i32
  }
  func.func @transform_4(%arg0: i32) -> (i32, i32, i32) {
    %c0_i32 = arith.constant 0 : i32
    %c0_i32_0 = arith.constant 0 : i32
    %c0_i32_1 = arith.constant 0 : i32
    %c0_i32_2 = arith.constant 0 : i32
    return %c0_i32, %c0_i32_0, %c0_i32_1 : i32, i32, i32
  }
  func.func @transform_5(%arg0: i32) -> (i32, i32, i32) {
    %c0_i32 = arith.constant 0 : i32
    %c0_i32_0 = arith.constant 0 : i32
    %c0_i32_1 = arith.constant 0 : i32
    %c0_i32_2 = arith.constant 0 : i32
    return %c0_i32, %c0_i32_0, %c0_i32_1 : i32, i32, i32
  }
  func.func @transform_6(%arg0: i32) -> (i32, i32, i32) {
    %c0_i32 = arith.constant 0 : i32
    %c0_i32_0 = arith.constant 0 : i32
    %c0_i32_1 = arith.constant 0 : i32
    %c0_i32_2 = arith.constant 0 : i32
    return %c0_i32, %c0_i32_0, %c0_i32_1 : i32, i32, i32
  }
  func.func @transform_7(%arg0: i32) -> (i32, i32, i32) {
    %c0_i32 = arith.constant 0 : i32
    %c0_i32_0 = arith.constant 0 : i32
    %c0_i32_1 = arith.constant 0 : i32
    %c0_i32_2 = arith.constant 0 : i32
    return %c0_i32, %c0_i32_0, %c0_i32_1 : i32, i32, i32
  }
  func.func @transform_8(%arg0: i32) -> (i32, i32) {
    %c0_i32 = arith.constant 0 : i32
    %c0_i32_0 = arith.constant 0 : i32
    %c0_i32_1 = arith.constant 0 : i32
    return %c0_i32, %c0_i32_0 : i32, i32
  }
  func.func @transform_9(%arg0: i32) -> (i32, i32) {
    %c0_i32 = arith.constant 0 : i32
    %c0_i32_0 = arith.constant 0 : i32
    %c0_i32_1 = arith.constant 0 : i32
    return %c0_i32, %c0_i32_0 : i32, i32
  }
  func.func @transform_10(%arg0: i32) -> (i32, i32) {
    %c0_i32 = arith.constant 0 : i32
    %c0_i32_0 = arith.constant 0 : i32
    return %arg0, %c0_i32 : i32, i32
  }
}

</mosaic_0001>

<bundles_post_ra>
// kernel: tpu_custom_call.1
= control target key start
LH: loop header
LB: loop body
LE: loop exit
PB: predicated region body
PF: predicated region fallthrough
CT: control target
= control target key end

     0   :  { %s5276_s0 = inlined_call_operand.vmem [shape: f32[128,16], index: 0, kind: input, shape index: {}]   ;;  %s5277_s1 = inlined_call_operand.hbm [shape: f32[32,128], index: 1, kind: input, shape index: {}]   ;;  %s5278_s2 = inlined_call_operand.hbm [shape: bf16[128,128], index: 2, kind: input, shape index: {}]   ;;  %s5279_s3 = inlined_call_operand.hbm [shape: bf16[16,128], index: 3, kind: input, shape index: {}]   ;;  %s5280_s4 = inlined_call_operand.hbm [shape: bf16[3,128,128], index: 4, kind: input, shape index: {}]   ;;  %s5281_s5 = inlined_call_operand.hbm [shape: bf16[3,128,128], index: 5, kind: input, shape index: {}]   ;;  %s5282_s6 = inlined_call_operand.hbm [shape: bf16[3,128,128], index: 6, kind: input, shape index: {}]   ;;  %s5283_s7 = inlined_call_operand.hbm [shape: bf16[3,128,256], index: 7, kind: input, shape index: {}]   ;;  %s5284_s8 = inlined_call_operand.vmem [shape: bf16[256,128], index: 8, kind: input, shape index: {}]   ;;  %s5285_s9 = inlined_call_operand.vmem [shape: f32[16,256], index: 9, kind: input, shape index: {}]   ;;  %s5286_s10 = inlined_call_operand.hbm [shape: f32[32,128], index: 10, kind: output, shape index: {}]  }
   0x1   :  { %5293 = sst [smem:[#allocation21_spill]] %s5278_s2 }
   0x2   :  { %5294 = sst [smem:[#allocation22_spill]] %s5279_s3 }
   0x3   :  { %5295 = sst [smem:[#allocation23_spill]] %s5280_s4 }
   0x4   :  { %5296 = sst [smem:[#allocation24_spill]] %s5281_s5 }
   0x5   :  { %15 = vsyncpa [#allocation4], 0 }
   0x6   :  { %17 = vsyncpa [#allocation4 + $0x1], 0 }
   0x7   :  { %18 = vsyncpa [#allocation7], 0 }
   0x8   :  { %19 = vsyncpa [#allocation10], 0 }
   0x9   :  { %20 = vsyncpa [#allocation13], 0 }
   0xa   :  { %21 = vsyncpa [#allocation5], 0 }
   0xb   :  { %23 = vsyncpa [#allocation5 + $0x1], 0  ;;  %s4710_s13 = smov 0   ;;  %s4712_s14 = smov 0  }
   0xc   :  { %s4714_s15 = smov 0   ;;  %s4716_s16 = smov 0  }
   0xd LB: > { %s4637_s17 = smov [#allocation6]   ;;  %s4731_s19 = sadd.s32 4294967295, %s4635_s16   ;;  %s4635_s16 = sphi %s4716_s16, %s5325_s16   ;;  %s4631_s15 = sphi %s4714_s15, %s5324_s15   ;;  %s4627_s14 = sphi %s4712_s14, %s5323_s14   ;;  %s4623_s13 = sphi %s4710_s13, %s5322_s13  }
   0xe   : > { %s292_s18 = sshll.u32 %s4637_s17, 4  ;;  %p3353_p0 = scmp.ge.s32.totalorder %s4635_s16, 1  ;;  %s293_s18 = int_to_ptr.vmem [resolvable:$true] %s292_s18 }
   0xf   : > { %p5289_p1 = scmp.eq.s32.totalorder %s4731_s19, 0  ;;  %p280_p2 = scmp.lt.s32.totalorder %s4635_s16, 3 }
  0x10   : > { %s4638_s21 = smov [#allocation9]   ;;  %s4639_s24 = smov [#allocation12]  }
  0x11   : > { %p4736_p3 = pnand %p3353_p0, %p280_p2  ;;  %s318_s22 = sshll.u32 %s4638_s21, 4  ;;  %s4749_s22 = int_to_ptr.vmem [resolvable:$true] %s318_s22 }
  0x12   : > { %s344_s25 = sshll.u32 %s4639_s24, 4  ;;  %s4386_s27 = scalar_lea.vmem %s293_s18, 1024  ;;  %s4751_s25 = int_to_ptr.vmem [resolvable:$true] %s344_s25 }
  0x13   : > { %s5297_s20 = scalar_select %p4736_p3, 1, 0 }
  0x14   : > { %p4115_p5 = pneg %p4736_p3  ;;  %p4387_p8 = scmp.ne.s32.totalorder %s293_s18, %s4386_s27 }
  0x15   : > { %p4394_p11 = scmp.lt.s32.totalorder %s293_s18, %s293_s18  ;;  %p4395_p12 = scmp.lt.s32.totalorder %s4386_s27, %s4386_s27 }
  0x16   : > { %p4745_p6 = pnand %p4115_p5, %p5289_p1 }
  0x17   : > { %p4396_p13 = por %p4395_p12, %p4394_p11 }
  0x18   : > { %p4755_p7 = pneg %p4745_p6 }
  0x1a   : > { %p4389_p9 = pnand %p4387_p8, %p4755_p7 }
  0x1c   : > { %p4390_p10 = pneg %p4389_p9 }
  0x1e   : > { %p4397_p0 = pnand %p4396_p13, %p4390_p10 }
  0x20   : > { %4400 = shalt.err (!%p4397_p0)
}
  0x21   : > { %s4640_s28 = smov 64   ;;  %s4641_s29 = smov 4  }
  0x22   : > { %s5300_s2 = sld [smem:[#allocation21_spill]]  ;;  %s4412_s12 = scalar_lea.vmem %s4749_s22, 3072 }
  0x23   : > { %p4413_p2 = scmp.ne.s32.totalorder %s4749_s22, %s4412_s12  ;;  %p4420_p9 = scmp.lt.s32.totalorder %s4749_s22, %s4749_s22 }
  0x24   : > { %p4421_p10 = scmp.lt.s32.totalorder %s4412_s12, %s4412_s12 }
  0x25   : > { %p4415_p5 = pnand %p4413_p2, %p4755_p7 }
  0x26   : > { %p4422_p11 = por %p4421_p10, %p4420_p9 }
  0x27   : > { %p4416_p8 = pneg %p4415_p5 }
  0x28   : > { %4118 = dma.hbm_to_vmem [thread:$0]  (!%p4745_p6), %s5300_s2, 1024, %s293_s18, [#allocation7], %s4640_s28, %s4640_s28, %s4641_s29  }
  0x29   : > { %p4423_p12 = pnand %p4422_p11, %p4416_p8 }
  0x2b   : > { %4426 = shalt.err (!%p4423_p12)
}
  0x2c   : > { %s5301_s4 = sld [smem:[#allocation23_spill]]  ;;  %s4438_s18 = scalar_lea.vmem %s4751_s25, 3072 }
  0x2d   : > { %p4439_p13 = scmp.ne.s32.totalorder %s4751_s25, %s4438_s18  ;;  %p4446_p5 = scmp.lt.s32.totalorder %s4751_s25, %s4751_s25 }
  0x2e   : > { %p4447_p8 = scmp.lt.s32.totalorder %s4438_s18, %s4438_s18 }
  0x2f   : > { %p4441_p0 = pnand %p4439_p13, %p4755_p7 }
  0x30   : > { %p4448_p9 = por %p4447_p8, %p4446_p5 }
  0x31   : > { %p4442_p2 = pneg %p4441_p0 }
  0x32   : > { %4124 = dma.hbm_to_vmem [thread:$0]  (!%p4745_p6), %s5301_s4, 3072, %s4749_s22, [#allocation10], %s4640_s28, %s4640_s28, %s4641_s29  }
  0x33   : > { %p4449_p10 = pnand %p4448_p9, %p4442_p2 }
  0x35   : > { %4452 = shalt.err (!%p4449_p10)
}
  0x36   : > { %4130 = dma.hbm_to_vmem [thread:$0]  (!%p4745_p6), %s5282_s6, 3072, %s4751_s25, [#allocation13], %s4640_s28, %s4640_s28, %s4641_s29  }
  0x37   : > { %s4642_s22 = smov [#allocation8]   ;;  %s4643_s11 = smov [#allocation11]  }
  0x38   : > { %s305_s30 = sshll.u32 %s4642_s22, 4  ;;  %s331_s12 = sshll.u32 %s4643_s11, 4  ;;  %s306_s30 = int_to_ptr.vmem [resolvable:$true] %s305_s30  ;;  %s332_s12 = int_to_ptr.vmem [resolvable:$true] %s331_s12 }
  0x39   : > { %s4464_s17 = scalar_lea.vmem %s306_s30, 128  ;;  %p4472_p0 = scmp.lt.s32.totalorder %s306_s30, %s306_s30 }
  0x3a   : > { %p4465_p11 = scmp.ne.s32.totalorder %s306_s30, %s4464_s17  ;;  %p4473_p2 = scmp.lt.s32.totalorder %s4464_s17, %s4464_s17 }
  0x3c   : > { %p4467_p12 = pnand %p4465_p11, %p4755_p7  ;;  %p4474_p5 = por %p4473_p2, %p4472_p0 }
  0x3e   : > { %p4468_p13 = pneg %p4467_p12 }
  0x40   : > { %p4475_p8 = pnand %p4474_p5, %p4468_p13 }
  0x42   : > { %4478 = shalt.err (!%p4475_p8)
}
  0x43   : > { %s5302_s3 = sld [smem:[#allocation22_spill]]  ;;  %s4490_s18 = scalar_lea.vmem %s332_s12, 3072 }
  0x44   : > { %p4491_p9 = scmp.ne.s32.totalorder %s332_s12, %s4490_s18  ;;  %p4498_p12 = scmp.lt.s32.totalorder %s332_s12, %s332_s12 }
  0x45   : > { %p4499_p0 = scmp.lt.s32.totalorder %s4490_s18, %s4490_s18 }
  0x46   : > { %p4493_p10 = pnand %p4491_p9, %p4755_p7 }
  0x47   : > { %p4500_p13 = por %p4499_p0, %p4498_p12 }
  0x48   : > { %p4494_p11 = pneg %p4493_p10 }
  0x49   : > { %4121 = dma.hbm_to_vmem [thread:$0]  (!%p4745_p6), %s5302_s3, 128, %s306_s30, [#allocation7], %s4640_s28, %s4640_s28, %s4641_s29  }
  0x4a   : > { %p4501_p2 = pnand %p4500_p13, %p4494_p11 }
  0x4c   : > { %4504 = shalt.err (!%p4501_p2)
}
  0x4d   : > { %s5303_s5 = sld [smem:[#allocation24_spill]]  ;;  %s4644_s22 = smov [#allocation14]  }
  0x4e   : > { %s357_s30 = sshll.u32 %s4644_s22, 4  ;;  %s358_s30 = int_to_ptr.vmem [resolvable:$true] %s357_s30 }
  0x4f   : > { %s4516_s11 = scalar_lea.vmem %s358_s30, 6144  ;;  %p4524_p10 = scmp.lt.s32.totalorder %s358_s30, %s358_s30 }
  0x50   : > { %p4517_p5 = scmp.ne.s32.totalorder %s358_s30, %s4516_s11  ;;  %p4525_p11 = scmp.lt.s32.totalorder %s4516_s11, %s4516_s11 }
  0x52   : > { %p4519_p8 = pnand %p4517_p5, %p4755_p7  ;;  %p4526_p12 = por %p4525_p11, %p4524_p10 }
  0x53   : > { %4127 = dma.hbm_to_vmem [thread:$0]  (!%p4745_p6), %s5303_s5, 3072, %s332_s12, [#allocation10], %s4640_s28, %s4640_s28, %s4641_s29  }
  0x54   : > { %p4520_p9 = pneg %p4519_p8 }
  0x56   : > { %p4527_p0 = pnand %p4526_p12, %p4520_p9 }
  0x58   : > { %4530 = shalt.err (!%p4527_p0)
}
  0x59   : > { %s5287_s17 = smov 128   ;;  %s5288_s26 = smov 8  }
  0x5a   : > { %4133 = dma.hbm_to_vmem [thread:$0]  (!%p4745_p6), %s5283_s7, 6144, %s358_s30, [#allocation13], %s5287_s17, %s5287_s17, %s5288_s26  }
  0x5b   : > { %s3352_s12 = sadd.s32 4294967294, %s4635_s16   ;;  %s4831_s25 = sadd.s32 1, %s4635_s16  }
  0x5c   : > { %s59_s21 = ssub.s32 %s4635_s16, %s4831_s25  ;;  %s62_s18 = sadd.s32 1, %s4631_s15 }
  0x5d   : > { %p60_p7 = scmp.eq.s32.totalorder %s59_s21, 0  ;;  %p69_p13 = scmp.ne.s32.totalorder %s4631_s15, %s4627_s14 }
  0x5e   : > { %p70_p2 = scmp.eq.s32.totalorder %s4635_s16, 0  ;;  %p75_p5 = scmp.ne.s32.totalorder %s4627_s14, %s4623_s13 }
  0x5f   : > { %s4842_s23 = scalar_select %p60_p7, %s4631_s15, %s62_s18  }
  0x60   : > { %p4844_p8 = por %p70_p2, %p69_p13  ;;  %p4850_p6 = por %p5289_p1, %p75_p5 }
  0x61   : > { %p267_p9 = scmp.eq.s32.totalorder %s4731_s19, 1  ;;  %p273_p10 = scmp.eq.s32.totalorder %s3352_s12, 1 }
  0x62   : > { %s5305_s27 = scalar_select %p4850_p6, 1, 0 }
  0x63   : > { %p4148_p11 = scmp.lt.s32.totalorder %s4635_s16, 2  ;;  %s386_s22 = sand.u32 1, %s4631_s15  }
  0x64   : > { %p4857_p12 = por %p267_p9, %p69_p13  ;;  %p4861_p0 = por %p273_p10, %p75_p5 }
  0x65   : > { %s3361_s28 = sshll.u32 %s386_s22, 4  ;;  %s3529_s29 = sshll.u32 %s4635_s16, 8 }
  0x66   : > { %s5306_s30 = scalar_select %p4857_p12, 1, 0 }
  0x67   : > { %s5307_s11 = scalar_select %p4861_p0, 1, 0 }
  0x68   : > { %s4869_s17 = scalar_lea.hbm %s5277_s1, %s3529_s29  ;;  %s390_s12 = scalar_lea.vmem [#allocation3], %s3361_s28 }
  0x69   : > { %s397_s26 = sshll.u32 %s390_s12, 4  ;;  %p4875_p7 = pnand %p4148_p11, %p4844_p8  ;;  %s4871_s26 = int_to_ptr.vmem [resolvable:$true] %s397_s26 }
  0x6a   : > { %s4879_s3 = scalar_lea.sflag [#allocation4], %s386_s22  ;;  %s4531_s4 = scalar_lea.hbm %s4869_s17, 256 }
  0x6b   : > { %p4532_p13 = scmp.ne.s32.totalorder %s4869_s17, %s4531_s4  ;;  %p4533_p2 = pneg %p4875_p7 }
  0x6c   : > { %s4536_s28 = scalar_lea.hbm %s5277_s1, 512  ;;  %p4537_p8 = scmp.lt.s32.totalorder %s4869_s17, %s5277_s1 }
  0x6d   : > { %p4534_p5 = pnand %p4533_p2, %p4532_p13  ;;  %p4538_p10 = scmp.lt.s32.totalorder %s4536_s28, %s4531_s4 }
  0x6f   : > { %p4535_p9 = pneg %p4534_p5  ;;  %p4539_p11 = por %p4538_p10, %p4537_p8 }
  0x71   : > { %p4540_p4 = pnand %p4539_p11, %p4535_p9 }
  0x73   : > { %4543 = shalt.err (!%p4540_p4)
}
  0x74   : > { %s4544_s24 = scalar_lea.vmem %s4871_s26, 256  ;;  %s4647_s22 = smov [#allocation3]  }
  0x75   : > { %p4545_p1 = scmp.ne.s32.totalorder %s4871_s26, %s4544_s24  ;;  %s4549_s5 = sshll.u32 %s4647_s22, 4  ;;  %s4550_s5 = int_to_ptr.vmem [resolvable:$false] %s4549_s5 }
  0x76   : > { %s4551_s29 = scalar_lea.vmem %s4550_s5, 512  ;;  %p4552_p5 = scmp.lt.s32.totalorder %s4871_s26, %s4550_s5 }
  0x77   : > { %p4547_p0 = pnand %p4545_p1, %p4533_p2  ;;  %p4553_p12 = scmp.lt.s32.totalorder %s4551_s29, %s4544_s24 }
  0x79   : > { %p4548_p13 = pneg %p4547_p0  ;;  %p4554_p6 = por %p4553_p12, %p4552_p5 }
  0x7b   : > { %p4555_p3 = pnand %p4554_p6, %p4548_p13 }
  0x7d   : > { %4558 = shalt.err (!%p4555_p3)
}
  0x7e   : > { %s5309_s4 = smov 8   ;;  %s5310_s21 = smov 128  }
  0x7f   : > { %4137 = dma.hbm_to_vmem [thread:$0]  (!%p4875_p7), %s4869_s17, 256, %s4871_s26, %s4879_s3, %s5310_s21, %s5310_s21, %s5309_s4  }
  0x80   : > { %p5311_p1 = scmp.ne.s32.totalorder %s5297_s20, 0 }
  0x81   : > { %s4906_s28 = sand.u32 (!%p5311_p1), 1, %s4627_s14   ;;  %p5312_p3 = scmp.ne.s32.totalorder (!%p5311_p1), %s5305_s27, 0 }
  0x82   : > { %409 = sbr.rel (%p5311_p1) target bundleno = 2259 (0x8d3), region = 60  ;;  %s3365_s5 = sshll.u32 (!%p5311_p1), %s4906_s28, 4 }
  0x83   : > { %s412_s18 = scalar_lea.sflag (!%p5311_p1), [#allocation4], %s4906_s28  ;;  %s4912_s2 = scalar_lea.vmem (!%p5311_p1), [#allocation3], %s3365_s5 }
  0x87   : > { %4602 = dma.done.wait (%p5312_p3), %s412_s18, 256  }
  0x88   : > { %4604 = vsyncadd (%p5312_p3), %s412_s18, 4294967040  ;;  %p5313_p4 = scmp.eq.s32.totalorder %s4731_s19, 0 }
  0x8a   : > { %4606 = dma.done.wait (%p5313_p4), [#allocation7], 1152   ;;  %p5314_p6 = pmov %p5313_p4 }
  0x8b   : > { %p5315_p12 = pmov %p5313_p4 }
  0x8c   : > { %4608 = vsyncadd (%p5314_p6), [#allocation7], 4294966144 }
  0x8d   : > { %4610 = dma.done.wait (%p5315_p12), [#allocation10], 6144   ;;  %p5316_p0 = pmov %p5313_p4 }
  0x8f   : > { %4612 = vsyncadd (%p5316_p0), [#allocation10], 4294961152  ;;  %p5317_p7 = pmov %p5316_p0 }
  0x90   : > { %p5318_p2 = pmov %p5316_p0 }
  0x91   : > { %4614 = dma.done.wait (%p5317_p7), [#allocation13], 9216  }
  0x92   : > { %4616 = vsyncadd (%p5318_p2), [#allocation13], 4294958080  ;;  %s3373_s3 = sshll.u32 %s4731_s19, 3  ;;  %v4204_v0 = vld [vmem:[#allocation8] sm:$0xff]   ;;  %vm519_vm0 = vcmask 130048   ;;  %v4206_v11 = vld [vmem:[#allocation9 + $0x30] sm:$0xff]   ;;  %v509_v22 = vlaneseq }
  0x93   : > { %p482_p9 = scmp.lt.s32.totalorder %s3373_s3, 15  ;;  %3729 = vmatprep.subr.bf16.mxu0 %v4204_v0  ;;  %v4205_v10 = vld [vmem:[#allocation9 + $0x38] sm:$0xff]   ;;  %v4207_v14 = vld [vmem:[#allocation9 + $0x28] sm:$0xff]   ;;  %v4208_v16 = vld [vmem:[#allocation9 + $0x20] sm:$0xff]   ;;  %v4648_v55 = vmov 0.0   ;;  %v4649_v61 = vmov 0.0|0.0  }
  0x94   : > { %3730 = vmatpush3.bf16.msra.mxu0 %v4204_v0  ;;  %3739 = vmatprep.subr.bf16.mxu1 %v4205_v10  ;;  %v4209_v17 = vld [vmem:[#allocation9 + $0x18] sm:$0xff]   ;;  %v4210_v18 = vld [vmem:[#allocation9 + $0x10] sm:$0xff]   ;;  %v4211_v19 = vld [vmem:[#allocation9 + $0x8] sm:$0xff]   ;;  %v4938_v23 = vshrl.u32 %v509_v22, 7  ;;  %vm4650_vm1 = vmmov 0   ;;  %s5210_s24 = scalar_lea.vmem [#allocation15], %s3365_s5 }
  0x95   : > { %s5327_s3 = smov (!%p482_p9, %s3373_s3), 15  ;;  %3740 = vmatpush3.bf16.msra.mxu1 %v4205_v10  ;;  %v4212_v20 = vld [vmem:[#allocation9] sm:$0xff]   ;;  %v4213_v21 = vld [vmem:[#allocation11 + $0x38] sm:$0xff]   ;;  %v4214_v45 = vld [vmem:[#allocation11 + $0x30] sm:$0xff]   ;;  %s3210_s5 = sshll.u32 %s5210_s24, 4  ;;  %s5227_s5 = int_to_ptr.vmem [resolvable:$true] %s3210_s5 }
  0x96   : > { %s3374_s20 = sshll.u32 %s5327_s3, 3  ;;  %3741 = vmatprep.subr.bf16.mxu1 %v4206_v11  ;;  %v4941_v24 = vsub.s32 0, %v4938_v23  ;;  %v4946_v26 = vld [vmem:[%s5285_s9] sm:$0xff]  ;;  %v607_v27 = vsub.s32 1, %v4938_v23  ;;  %v612_v32 = vsub.s32 2, %v4938_v23  ;;  %v4215_v50 = vld [vmem:[#allocation11 + $0x28] sm:$0xff]  }
  0x97   : > { %s485_s27 = scalar_lea.vmem %s5276_s0, %s3374_s20  ;;  %v493_v35 = vld [vmem:[%s4912_s2] sm:$0xff]  ;;  %v4216_v58 = vld [vmem:[#allocation11 + $0x20] sm:$0xff]   ;;  %v4218_v60 = vld [vmem:[#allocation11 + $0x10] sm:$0xff]   ;;  %s3530_s4 = sshll.u32 %s4731_s19, 8 }
  0x98   : > { %v495_v1 = vld [vmem:[%s485_s27] sm:$0xff]  ;;  %v496_v2 = vld [vmem:[%s485_s27 + $0x8] sm:$0xff]  ;;  %v497_v3 = vld [vmem:[%s485_s27 + $0x10] sm:$0xff]  ;;  %v512_v29 = vrot.slane %v4946_v26, %v4941_v24  ;;  %v608_v31 = vrot.slane %v4946_v26, %v607_v27  ;;  %v613_v42 = vrot.slane %v4946_v26, %v612_v32  ;;  %s3197_s3 = scalar_lea.sflag [#allocation5], %s4906_s28  ;;  %s4559_s20 = scalar_lea.vmem %s5227_s5, 256 }
  0x99   : > { %v503_v4 = vpack.c.bf16 %v496_v2, %v495_v1  ;;  %v498_v5 = vld [vmem:[%s485_s27 + $0x18] sm:$0xff]  ;;  %v499_v6 = vld [vmem:[%s485_s27 + $0x20] sm:$0xff]  ;;  %v500_v7 = vld [vmem:[%s485_s27 + $0x28] sm:$0xff]  ;;  %3742 = vmatpush3.bf16.msra.mxu1 %v4206_v11  ;;  %p4560_p8 = scmp.ne.s32.totalorder %s5227_s5, %s4559_s20  ;;  %p5319_p10 = scmp.ne.s32.totalorder %s5306_s30, 0 }
  0x9a   : > { %v504_v8 = vpack.c.bf16 %v498_v5, %v497_v3  ;;  %v505_v9 = vpack.c.bf16 %v500_v7, %v499_v6  ;;  %v501_v12 = vld [vmem:[%s485_s27 + $0x30] sm:$0xff]  ;;  %v502_v13 = vld [vmem:[%s485_s27 + $0x38] sm:$0xff]  ;;  %3743 = vmatprep.subr.bf16.mxu1 %v4207_v14  ;;  %v609_v41 = vmul.f32 %v608_v31, %v493_v35  ;;  %v4217_v59 = vld [vmem:[#allocation11 + $0x18] sm:$0xff]   ;;  %s4652_s19 = smov [#allocation15]  }
  0x9b   : > { %3731 = vmatprep.mubr.msk.bf16.mxu0 %vm519_vm0, %v503_v4  ;;  %v506_v15 = vpack.c.bf16 %v502_v13, %v501_v12  ;;  %v4219_v62 = vld [vmem:[#allocation11 + $0x8] sm:$0xff]   ;;  %v4220_v63 = vld [vmem:[#allocation11] sm:$0xff]   ;;  %v4960_v0 = vld [vmem:[#allocation6] sm:$0xff]   ;;  %v681_v13 = vsub.s32 7, %v4938_v23  ;;  %p4561_p11 = pnand %p4560_p8, %p5319_p10  ;;  %s4563_s17 = sshll.u32 %s4652_s19, 4  ;;  %s4564_s17 = int_to_ptr.vmem [resolvable:$false] %s4563_s17 }
  0x9c   : > { %3732 = vmatmul.mubr.msk.bf16.vlgmr.msra.gmra.mxu0 %vm519_vm0, %v504_v8  ;;  %v614_v47 = vadd.f32 %v613_v42, %v609_v41  ;;  %s4565_s26 = scalar_lea.vmem %s4564_s17, 512  ;;  %p4566_p5 = scmp.lt.s32.totalorder %s5227_s5, %s4564_s17 }
  0x9d   : > { %3735 = vmatprep.mubr.msk.bf16.mxu0 %vm519_vm0, %v505_v9  ;;  %3744 = vmatpush3.bf16.msra.mxu1 %v4207_v14  ;;  %p4562_p13 = pneg %p4561_p11  ;;  %p4567_p1 = scmp.lt.s32.totalorder %s4565_s26, %s4559_s20 }
  0x9e   : > { %3745 = vmatprep.subr.bf16.mxu1 %v4208_v16  ;;  %v659_v56 = vpack.c.bf16 %v4648_v55, %v614_v47  ;;  %v4229_v47 = vld [vmem:[#allocation9 + $0x78] sm:$0xff]  }
  0x9f   : > { %p4568_p3 = por %p4567_p1, %p4566_p5 }
  0xa1   : > { %3746 = vmatpush3.bf16.msra.mxu1 %v4208_v16  ;;  %v682_v16 = vrot.slane %v4946_v26, %v681_v13  ;;  %p4569_p4 = pnand %p4568_p3, %p4562_p13 }
  0xa2   : > { %3747 = vmatprep.subr.bf16.mxu1 %v4209_v17 }
  0xa4   : > { %3736 = vmatmul.mubr.msk.bf16.gmra.mxu0 %vm519_vm0, %v506_v15 }
  0xa5   : > { %3748 = vmatpush3.bf16.msra.mxu1 %v4209_v17  ;;  %3787 = vmatprep.mubr.bf16.mxu0 %v4960_v0 }
  0xa6   : > { %3749 = vmatprep.subr.bf16.mxu1 %v4210_v18 }
  0xa9   : > { %3750 = vmatpush3.bf16.msra.mxu1 %v4210_v18 }
  0xaa   : > { %3751 = vmatprep.subr.bf16.mxu1 %v4211_v19 }
  0xad   : > { %3752 = vmatpush3.bf16.msra.mxu1 %v4211_v19 }
  0xae   : > { %3753 = vmatprep.subr.bf16.mxu1 %v4212_v20 }
  0xb1   : > { %3754 = vmatpush3.bf16.msra.mxu1 %v4212_v20 }
  0xb2   : > { %3803 = vmatprep.subr.bf16.mxu1 %v4213_v21 }
 0x15c   : > { %v3733_v25 = vpop.f32.mrf.mxu0 }
 0x15d   : > { %v575_v38 = vadd.f32 %v3733_v25, %v512_v29 }
 0x15e   : > { %v566_v28 = vpop.f32.mrf.mxu0 }
 0x15f   : > { %v567_v36 = vadd.f32 %v566_v28, %v512_v29 }
 0x160   : > { %v3734_v30 = vpop.f32.mrf.mxu0 }
 0x161   : > { %v578_v33 = vadd.f32 %v3734_v30, %v512_v29 }
 0x162   : > { %v569_v34 = vpop.f32.mrf.mxu0 }
 0x163   : > { %v570_v37 = vadd.f32 %v569_v34, %v512_v29  ;;  %v656_v43 = vpack.c.bf16 %v578_v33, %v575_v38 }
 0x164   : > { %v3737_v39 = vpop.f32.mrf.mxu0 }
 0x165   : > { %v655_v40 = vpack.c.bf16 %v570_v37, %v567_v36  ;;  %v591_v53 = vadd.f32 %v3737_v39, %v512_v29 }
 0x166   : > { %v582_v44 = vpop.f32.mrf.mxu0 }
 0x167   : > { %3755 = vmatprep.mubr.bf16.mxu1 %v655_v40  ;;  %v583_v51 = vadd.f32 %v582_v44, %v512_v29 }
 0x168   : > { %v3738_v46 = vpop.f32.mrf.mxu0  ;;  %3756 = vmatmul.mubr.bf16.vlgmr.msra.gmra.mxu1 %v656_v43 }
 0x169   : > { %3804 = vmatpush3.bf16.msra.mxu1 %v4213_v21  ;;  %v594_v48 = vadd.f32 %v3738_v46, %v512_v29 }
 0x16a   : > { %v585_v49 = vpop.f32.mrf.mxu0  ;;  %3805 = vmatprep.subr.bf16.mxu1 %v4214_v45 }
 0x16b   : > { %v586_v52 = vadd.f32 %v585_v49, %v512_v29  ;;  %v658_v57 = vpack.c.bf16 %v594_v48, %v591_v53  ;;  %v4968_v48 = vld [vmem:[#allocation6 + $0x8] sm:$0xff]   ;;  %v4970_v49 = vld [vmem:[#allocation6 + $0x10] sm:$0xff]   ;;  %v4976_v53 = vld [vmem:[#allocation6 + $0x20] sm:$0xff]  }
 0x16d   : > { %v657_v54 = vpack.c.bf16 %v586_v52, %v583_v51  ;;  %3806 = vmatpush3.bf16.msra.mxu1 %v4214_v45  ;;  %v4231_v51 = vld [vmem:[#allocation9 + $0x68] sm:$0xff]   ;;  %v4974_v52 = vld [vmem:[#allocation6 + $0x18] sm:$0xff]  }
 0x16e   : > { %3807 = vmatprep.subr.bf16.mxu1 %v4215_v50 }
 0x16f   : > { %3759 = vmatprep.mubr.bf16.mxu1 %v657_v54 }
 0x170   : > { %3760 = vmatmul.mubr.bf16.gmra.mxu1 %v658_v57 }
 0x171   : > { %3808 = vmatpush3.bf16.msra.mxu1 %v4215_v50  ;;  %3763 = vmatprep.mubr.bf16.mxu1 %v659_v56  ;;  %v4230_v50 = vld [vmem:[#allocation9 + $0x70] sm:$0xff]  }
 0x172   : > { %3809 = vmatprep.subr.bf16.mxu1 %v4216_v58 }
 0x175   : > { %3810 = vmatpush3.bf16.msra.mxu1 %v4216_v58  ;;  %v4982_v58 = vld [vmem:[#allocation6 + $0x30] sm:$0xff]  }
 0x176   : > { %3811 = vmatprep.subr.bf16.mxu1 %v4217_v59 }
 0x178   : > { %3764 = vmatmul.mubr.bf16.gmra.mxu1 %v4649_v61 }
 0x179   : > { %3812 = vmatpush3.bf16.msra.mxu1 %v4217_v59  ;;  %3767 = vmatprep.mubr.bf16.mxu1 %v4649_v61  ;;  %v4986_v59 = vld [vmem:[#allocation6 + $0x38] sm:$0xff]  }
 0x17a   : > { %3813 = vmatprep.subr.bf16.mxu1 %v4218_v60 }
 0x17d   : > { %3814 = vmatpush3.bf16.msra.mxu1 %v4218_v60  ;;  %v4234_v60 = vld [vmem:[#allocation9 + $0x50] sm:$0xff]  }
 0x17e   : > { %3815 = vmatprep.subr.bf16.mxu1 %v4219_v62 }
 0x180   : > { %3768 = vmatmul.mubr.bf16.gmra.mxu1 %v4649_v61 }
 0x181   : > { %3816 = vmatpush3.bf16.msra.mxu1 %v4219_v62  ;;  %3819 = vmatprep.mubr.bf16.mxu1 %v655_v40  ;;  %v4236_v62 = vld [vmem:[#allocation9 + $0x40] sm:$0xff]  }
 0x182   : > { %3817 = vmatprep.subr.bf16.mxu1 %v4220_v63 }
 0x185   : > { %3818 = vmatpush3.bf16.msra.mxu1 %v4220_v63  ;;  %v4237_v63 = vld [vmem:[#allocation11 + $0x78] sm:$0xff]  }
 0x188   : > { %3820 = vmatmul.mubr.bf16.vlgmr.msra.gmra.mxu1 %v656_v43 }
 0x189   : > { %3823 = vmatprep.mubr.bf16.mxu1 %v657_v54  ;;  %v4232_v54 = vld [vmem:[#allocation9 + $0x60] sm:$0xff]  }
 0x190   : > { %3824 = vmatmul.mubr.bf16.gmra.mxu1 %v658_v57  ;;  %v4980_v57 = vld [vmem:[#allocation6 + $0x28] sm:$0xff]  }
 0x191   : > { %3827 = vmatprep.mubr.bf16.mxu1 %v659_v56  ;;  %v4233_v56 = vld [vmem:[#allocation9 + $0x58] sm:$0xff]  }
 0x198   : > { %3828 = vmatmul.mubr.bf16.gmra.mxu1 %v4649_v61 }
 0x199   : > { %3831 = vmatprep.mubr.bf16.mxu1 %v4649_v61 }
 0x1a0   : > { %3832 = vmatmul.mubr.bf16.gmra.mxu1 %v4649_v61  ;;  %v4235_v61 = vld [vmem:[#allocation9 + $0x48] sm:$0xff]  }
 0x1a1   : > { %3883 = vmatprep.mubr.bf16.mxu1 %v4960_v0 }
 0x228   : > { %v3757_v1 = vpop.f32.mrf.mxu1 }
 0x229   : > { %v774_v42 = vadd.f32 %v3757_v1, %v682_v16 }
 0x22a   : > { %v765_v2 = vpop.f32.mrf.mxu1 }
 0x22b   : > { %v766_v45 = vadd.f32 %v765_v2, %v682_v16 }
 0x22c   : > { %v3758_v3 = vpop.f32.mrf.mxu1 }
 0x22d   : > { %v777_v40 = vadd.f32 %v3758_v3, %v682_v16 }
 0x22e   : > { %v768_v4 = vpop.f32.mrf.mxu1 }
 0x22f   : > { %v829_v43 = vpack.c.bf16 %v777_v40, %v774_v42  ;;  %v769_v44 = vadd.f32 %v768_v4, %v682_v16 }
 0x230   : > { %v3761_v5 = vpop.f32.mrf.mxu1 }
 0x231   : > { %v790_v36 = vadd.f32 %v3761_v5, %v682_v16  ;;  %v828_v46 = vpack.c.bf16 %v769_v44, %v766_v45 }
 0x232   : > { %v781_v6 = vpop.f32.mrf.mxu1 }
 0x233   : > { %v782_v39 = vadd.f32 %v781_v6, %v682_v16 }
 0x234   : > { %v3762_v7 = vpop.f32.mrf.mxu1 }
 0x235   : > { %v793_v35 = vadd.f32 %v3762_v7, %v682_v16 }
 0x236   : > { %v784_v8 = vpop.f32.mrf.mxu1 }
 0x237   : > { %v831_v37 = vpack.c.bf16 %v793_v35, %v790_v36  ;;  %v785_v38 = vadd.f32 %v784_v8, %v682_v16 }
 0x238   : > { %v3765_v9 = vpop.f32.mrf.mxu1 }
 0x239   : > { %v806_v30 = vadd.f32 %v3765_v9, %v682_v16  ;;  %v830_v41 = vpack.c.bf16 %v785_v38, %v782_v39  ;;  %v4992_v9 = vld [vmem:[%s5285_s9 + $0x10] sm:$0xff] }
 0x23a   : > { %v797_v10 = vpop.f32.mrf.mxu1 }
 0x23b   : > { %v798_v34 = vadd.f32 %v797_v10, %v682_v16 }
 0x23c   : > { %v3766_v11 = vpop.f32.mrf.mxu1 }
 0x23d   : > { %v809_v28 = vadd.f32 %v3766_v11, %v682_v16  ;;  %v4997_v11 = vrot.slane %v4992_v9, %v612_v32 }
 0x23e   : > { %v800_v12 = vpop.f32.mrf.mxu1 }
 0x23f   : > { %v833_v31 = vpack.c.bf16 %v809_v28, %v806_v30  ;;  %v801_v33 = vadd.f32 %v800_v12, %v682_v16 }
 0x240   : > { %v3769_v14 = vpop.f32.mrf.mxu1 }
 0x241   : > { %v822_v18 = vadd.f32 %v3769_v14, %v682_v16  ;;  %v832_v26 = vpack.c.bf16 %v801_v33, %v798_v34 }
 0x242   : > { %v813_v15 = vpop.f32.mrf.mxu1 }
 0x243   : > { %v814_v21 = vadd.f32 %v813_v15, %v682_v16 }
 0x244   : > { %v3770_v17 = vpop.f32.mrf.mxu1 }
 0x245   : > { %v825_v19 = vadd.f32 %v3770_v17, %v682_v16 }
 0x246   : > { %v816_v20 = vpop.f32.mrf.mxu1 }
 0x247   : > { %v835_v22 = vpack.c.bf16 %v825_v19, %v822_v18  ;;  %v817_v25 = vadd.f32 %v816_v20, %v682_v16 }
 0x248   : > { %v3821_v1 = vpop.f32.mrf.mxu1 }
 0x249   : > { %v834_v29 = vpack.c.bf16 %v817_v25, %v814_v21  ;;  %3771 = vmatprep.subr.bf16.mxu0 %v835_v22  ;;  %v1092_v18 = vadd.f32 %v3821_v1, %v4997_v11 }
 0x24a   : > { %3772 = vmatpush3.bf16.msra.mxu0 %v835_v22  ;;  %v1083_v2 = vpop.f32.mrf.mxu1 }
 0x24b   : > { %3773 = vmatprep.subr.bf16.mxu0 %v834_v29  ;;  %v1084_v16 = vadd.f32 %v1083_v2, %v4997_v11 }
 0x24c   : > { %v3822_v3 = vpop.f32.mrf.mxu1 }
 0x24d   : > { %v1095_v17 = vadd.f32 %v3822_v3, %v4997_v11 }
 0x24e   : > { %3774 = vmatpush3.bf16.msra.mxu0 %v834_v29  ;;  %v1086_v4 = vpop.f32.mrf.mxu1 }
 0x24f   : > { %3775 = vmatprep.subr.bf16.mxu0 %v833_v31  ;;  %v1087_v20 = vadd.f32 %v1086_v4, %v4997_v11 }
 0x250   : > { %v3825_v5 = vpop.f32.mrf.mxu1 }
 0x251   : > { %v1108_v40 = vadd.f32 %v3825_v5, %v4997_v11 }
 0x252   : > { %3776 = vmatpush3.bf16.msra.mxu0 %v833_v31  ;;  %v1099_v6 = vpop.f32.mrf.mxu1 }
 0x253   : > { %3777 = vmatprep.subr.bf16.mxu0 %v832_v26 }
 0x254   : > { %v3826_v7 = vpop.f32.mrf.mxu1 }
 0x255   : > { %v1111_v38 = vadd.f32 %v3826_v7, %v4997_v11 }
 0x256   : > { %3778 = vmatpush3.bf16.msra.mxu0 %v832_v26  ;;  %v1102_v8 = vpop.f32.mrf.mxu1 }
 0x257   : > { %3779 = vmatprep.subr.bf16.mxu0 %v831_v37  ;;  %v1103_v44 = vadd.f32 %v1102_v8, %v4997_v11 }
 0x258   : > { %v3829_v10 = vpop.f32.mrf.mxu1 }
 0x259   : > { %v1124_v3 = vadd.f32 %v3829_v10, %v4997_v11 }
 0x25a   : > { %3780 = vmatpush3.bf16.msra.mxu0 %v831_v37  ;;  %v1115_v15 = vpop.f32.mrf.mxu1  ;;  %v1100_v37 = vadd.f32 %v1099_v6, %v4997_v11 }
 0x25b   : > { %3781 = vmatprep.subr.bf16.mxu0 %v830_v41  ;;  %v1116_v6 = vadd.f32 %v1115_v15, %v4997_v11 }
 0x25c   : > { %v3830_v29 = vpop.f32.mrf.mxu1 }
 0x25d   : > { %v1127_v7 = vadd.f32 %v3830_v29, %v4997_v11 }
 0x25e   : > { %3782 = vmatpush3.bf16.msra.mxu0 %v830_v41  ;;  %v1118_v36 = vpop.f32.mrf.mxu1 }
 0x25f   : > { %3783 = vmatprep.subr.bf16.mxu0 %v829_v43 }
 0x262   : > { %3784 = vmatpush3.bf16.msra.mxu0 %v829_v43  ;;  %v4238_v43 = vld [vmem:[#allocation11 + $0x70] sm:$0xff]  }
 0x263   : > { %3785 = vmatprep.subr.bf16.mxu0 %v828_v46 }
 0x266   : > { %3786 = vmatpush3.bf16.msra.mxu0 %v828_v46 }
 0x267   : > { %3835 = vmatprep.subr.bf16.mxu0 %v4229_v47 }
 0x269   : > { %3788 = vmatmul.mubr.bf16.vlgmr.msra.gmra.mxu0 %v4968_v48 }
 0x26a   : > { %3791 = vmatprep.mubr.bf16.mxu0 %v4970_v49  ;;  %3836 = vmatpush3.bf16.msra.mxu0 %v4229_v47 }
 0x26b   : > { %3837 = vmatprep.subr.bf16.mxu0 %v4230_v50 }
 0x26e   : > { %3838 = vmatpush3.bf16.msra.mxu0 %v4230_v50 }
 0x26f   : > { %3839 = vmatprep.subr.bf16.mxu0 %v4231_v51 }
 0x271   : > { %3792 = vmatmul.mubr.bf16.gmra.mxu0 %v4974_v52 }
 0x272   : > { %3795 = vmatprep.mubr.bf16.mxu0 %v4976_v53  ;;  %3840 = vmatpush3.bf16.msra.mxu0 %v4231_v51  ;;  %v3833_v51 = vpop.f32.mrf.mxu1 }
 0x273   : > { %3841 = vmatprep.subr.bf16.mxu0 %v4232_v54 }
 0x274   : > { %v1131_v5 = vpop.f32.mrf.mxu1 }
 0x276   : > { %3842 = vmatpush3.bf16.msra.mxu0 %v4232_v54 }
 0x277   : > { %3843 = vmatprep.subr.bf16.mxu0 %v4233_v56 }
 0x279   : > { %3796 = vmatmul.mubr.bf16.gmra.mxu0 %v4980_v57 }
 0x27a   : > { %3799 = vmatprep.mubr.bf16.mxu0 %v4982_v58  ;;  %3844 = vmatpush3.bf16.msra.mxu0 %v4233_v56 }
 0x27b   : > { %3845 = vmatprep.subr.bf16.mxu0 %v4234_v60 }
 0x27e   : > { %3846 = vmatpush3.bf16.msra.mxu0 %v4234_v60 }
 0x27f   : > { %3847 = vmatprep.subr.bf16.mxu0 %v4235_v61 }
 0x281   : > { %3800 = vmatmul.mubr.bf16.gmra.mxu0 %v4986_v59 }
 0x282   : > { %3848 = vmatpush3.bf16.msra.mxu0 %v4235_v61  ;;  %v4239_v61 = vld [vmem:[#allocation11 + $0x68] sm:$0xff]  }
 0x283   : > { %3849 = vmatprep.subr.bf16.mxu0 %v4236_v62 }
 0x286   : > { %3850 = vmatpush3.bf16.msra.mxu0 %v4236_v62 }
 0x287   : > { %3899 = vmatprep.subr.bf16.mxu0 %v4237_v63 }
 0x329   : > { %v3789_v12 = vpop.f32.mrf.mxu0 }
 0x32a   : > { %v1148_v25 = vadd.f32 %v3789_v12, %v1092_v18 }
 0x32b   : > { %v918_v14 = vpop.f32.mrf.mxu0 }
 0x32c   : > { %v1146_v21 = vadd.f32 %v1084_v16, %v918_v14  ;;  %v1164_v35 = vmax.f32 %v1148_v25, 0.0  ;;  %v1119_v16 = vadd.f32 %v1118_v36, %v4997_v11  ;;  %v4241_v25 = vld [vmem:[#allocation11 + $0x58] sm:$0xff]  }
 0x32d   : > { %v3790_v19 = vpop.f32.mrf.mxu0 }
 0x32e   : > { %v1149_v22 = vadd.f32 %v3790_v19, %v1095_v17  ;;  %v1162_v33 = vmax.f32 %v1146_v21, 0.0 }
 0x32f   : > { %v921_v28 = vpop.f32.mrf.mxu0 }
 0x330   : > { %v1147_v30 = vadd.f32 %v1087_v20, %v921_v28  ;;  %v1165_v32 = vmax.f32 %v1149_v22, 0.0  ;;  %v3834_v20 = vpop.f32.mrf.mxu1 }
 0x331   : > { %v3793_v31 = vpop.f32.mrf.mxu0 }
 0x332   : > { %v1163_v34 = vmax.f32 %v1147_v30, 0.0  ;;  %v5008_v41 = vpack.c.bf16 %v1165_v32, %v1164_v35  ;;  %v1152_v47 = vadd.f32 %v3793_v31, %v1108_v40  ;;  %v1140_v32 = vadd.f32 %v3833_v51, %v4997_v11  ;;  %v1134_v31 = vpop.f32.mrf.mxu1 }
 0x333   : > { %v934_v26 = vpop.f32.mrf.mxu0  ;;  %v1143_v35 = vadd.f32 %v3834_v20, %v4997_v11  ;;  %v1135_v40 = vadd.f32 %v1134_v31, %v4997_v11 }
 0x334   : > { %v5005_v39 = vpack.c.bf16 %v1163_v34, %v1162_v33  ;;  %v1150_v45 = vadd.f32 %v1100_v37, %v934_v26  ;;  %v1168_v2 = vmax.f32 %v1152_v47, 0.0  ;;  %v1132_v34 = vadd.f32 %v1131_v5, %v4997_v11 }
 0x335   : > { %v3794_v42 = vpop.f32.mrf.mxu0 }
 0x336   : > { %v1153_v46 = vadd.f32 %v3794_v42, %v1111_v38  ;;  %3851 = vmatprep.mubr.bf16.mxu0 %v5005_v39  ;;  %v1166_v62 = vmax.f32 %v1150_v45, 0.0  ;;  %v4242_v38 = vld [vmem:[#allocation11 + $0x50] sm:$0xff]  }
 0x337   : > { %v937_v50 = vpop.f32.mrf.mxu0  ;;  %3852 = vmatmul.mubr.bf16.vlgmr.msra.gmra.mxu0 %v5008_v41 }
 0x338   : > { %v1151_v54 = vadd.f32 %v1103_v44, %v937_v50  ;;  %3900 = vmatpush3.bf16.msra.mxu0 %v4237_v63  ;;  %v1169_v56 = vmax.f32 %v1153_v46, 0.0  ;;  %v4240_v63 = vld [vmem:[#allocation11 + $0x60] sm:$0xff]   ;;  %v4243_v50 = vld [vmem:[#allocation11 + $0x48] sm:$0xff]  }
 0x339   : > { %v3797_v60 = vpop.f32.mrf.mxu0  ;;  %3901 = vmatprep.subr.bf16.mxu0 %v4238_v43 }
 0x33a   : > { %v1167_v1 = vmax.f32 %v1151_v54, 0.0  ;;  %v1213_v12 = vpack.c.bf16 %v1169_v56, %v1168_v2  ;;  %v1156_v19 = vadd.f32 %v3797_v60, %v1124_v3 }
 0x33b   : > { %v950_v4 = vpop.f32.mrf.mxu0 }
 0x33c   : > { %v1212_v8 = vpack.c.bf16 %v1167_v1, %v1166_v62  ;;  %3902 = vmatpush3.bf16.msra.mxu0 %v4238_v43  ;;  %v1154_v17 = vadd.f32 %v1116_v6, %v950_v4  ;;  %v1172_v30 = vmax.f32 %v1156_v19, 0.0  ;;  %v4244_v62 = vld [vmem:[#allocation11 + $0x40] sm:$0xff]  }
 0x33d   : > { %v3798_v14 = vpop.f32.mrf.mxu0  ;;  %3903 = vmatprep.subr.bf16.mxu0 %v4239_v61 }
 0x33e   : > { %v1157_v18 = vadd.f32 %v3798_v14, %v1127_v7  ;;  %3855 = vmatprep.mubr.bf16.mxu0 %v1212_v8  ;;  %v1170_v28 = vmax.f32 %v1154_v17, 0.0 }
 0x33f   : > { %v953_v10 = vpop.f32.mrf.mxu0  ;;  %3856 = vmatmul.mubr.bf16.gmra.mxu0 %v1213_v12 }
 0x340   : > { %v1155_v21 = vadd.f32 %v1119_v16, %v953_v10  ;;  %3904 = vmatpush3.bf16.msra.mxu0 %v4239_v61  ;;  %v1173_v15 = vmax.f32 %v1157_v18, 0.0  ;;  %v1238_v16 = vrot.slane %v4992_v9, %v4941_v24 }
 0x341   : > { %v3801_v22 = vpop.f32.mrf.mxu0  ;;  %3905 = vmatprep.subr.bf16.mxu0 %v4240_v63 }
 0x342   : > { %v1171_v29 = vmax.f32 %v1155_v21, 0.0  ;;  %v1215_v36 = vpack.c.bf16 %v1173_v15, %v1172_v30  ;;  %v1160_v44 = vadd.f32 %v3801_v22, %v1140_v32 }
 0x343   : > { %v966_v33 = vpop.f32.mrf.mxu0 }
 0x344   : > { %v1214_v26 = vpack.c.bf16 %v1171_v29, %v1170_v28  ;;  %3906 = vmatpush3.bf16.msra.mxu0 %v4240_v63  ;;  %v1158_v42 = vadd.f32 %v1132_v34, %v966_v33  ;;  %v1176_v56 = vmax.f32 %v1160_v44, 0.0 }
 0x345   : > { %v3802_v37 = vpop.f32.mrf.mxu0  ;;  %3907 = vmatprep.subr.bf16.mxu0 %v4241_v25 }
 0x346   : > { %v1161_v43 = vadd.f32 %v3802_v37, %v1143_v35  ;;  %3859 = vmatprep.mubr.bf16.mxu0 %v1214_v26  ;;  %v1174_v51 = vmax.f32 %v1158_v42, 0.0 }
 0x347   : > { %v969_v45 = vpop.f32.mrf.mxu0  ;;  %3860 = vmatmul.mubr.bf16.gmra.mxu0 %v1215_v36 }
 0x348   : > { %v1159_v46 = vadd.f32 %v1135_v40, %v969_v45  ;;  %3908 = vmatpush3.bf16.msra.mxu0 %v4241_v25  ;;  %v1177_v47 = vmax.f32 %v1161_v43, 0.0  ;;  %v4245_v45 = vld [vmem:[#allocation9 + $0xb8] sm:$0xff]  }
 0x349   : > { %3909 = vmatprep.subr.bf16.mxu0 %v4242_v38 }
 0x34a   : > { %v1175_v54 = vmax.f32 %v1159_v46, 0.0  ;;  %v1217_v61 = vpack.c.bf16 %v1177_v47, %v1176_v56  ;;  %v4246_v46 = vld [vmem:[#allocation9 + $0xb0] sm:$0xff]   ;;  %v4247_v47 = vld [vmem:[#allocation9 + $0xa8] sm:$0xff]  }
 0x34b   : > { %v4251_v56 = vld [vmem:[#allocation9 + $0x88] sm:$0xff]  }
 0x34c   : > { %v1216_v60 = vpack.c.bf16 %v1175_v54, %v1174_v51  ;;  %3910 = vmatpush3.bf16.msra.mxu0 %v4242_v38  ;;  %v4249_v51 = vld [vmem:[#allocation9 + $0x98] sm:$0xff]   ;;  %v4250_v54 = vld [vmem:[#allocation9 + $0x90] sm:$0xff]  }
 0x34d   : > { %3911 = vmatprep.subr.bf16.mxu0 %v4243_v50 }
 0x34e   : > { %3863 = vmatprep.mubr.bf16.mxu0 %v1216_v60 }
 0x34f   : > { %3864 = vmatmul.mubr.bf16.gmra.mxu0 %v1217_v61 }
 0x350   : > { %3912 = vmatpush3.bf16.msra.mxu0 %v4243_v50  ;;  %3915 = vmatprep.mubr.bf16.mxu0 %v5005_v39  ;;  %v4248_v50 = vld [vmem:[#allocation9 + $0xa0] sm:$0xff]  }
 0x351   : > { %3913 = vmatprep.subr.bf16.mxu0 %v4244_v62 }
 0x354   : > { %3914 = vmatpush3.bf16.msra.mxu0 %v4244_v62 }
 0x357   : > { %3916 = vmatmul.mubr.bf16.vlgmr.msra.gmra.mxu0 %v5008_v41 }
 0x358   : > { %3919 = vmatprep.mubr.bf16.mxu0 %v1212_v8 }
 0x35f   : > { %3920 = vmatmul.mubr.bf16.gmra.mxu0 %v1213_v12 }
 0x360   : > { %3923 = vmatprep.mubr.bf16.mxu0 %v1214_v26 }
 0x367   : > { %3924 = vmatmul.mubr.bf16.gmra.mxu0 %v1215_v36 }
 0x368   : > { %3927 = vmatprep.mubr.bf16.mxu0 %v1216_v60  ;;  %v4252_v60 = vld [vmem:[#allocation9 + $0x80] sm:$0xff]  }
 0x36f   : > { %3928 = vmatmul.mubr.bf16.gmra.mxu0 %v1217_v61  ;;  %v4253_v61 = vld [vmem:[#allocation11 + $0xb8] sm:$0xff]  }
 0x370   : > { %3979 = vmatprep.mubr.bf16.mxu0 %v4960_v0 }
 0x3f7   : > { %v3853_v11 = vpop.f32.mrf.mxu0 }
 0x3f8   : > { %v1330_v38 = vadd.f32 %v3853_v11, %v1238_v16 }
 0x3f9   : > { %v1321_v1 = vpop.f32.mrf.mxu0 }
 0x3fa   : > { %v1322_v43 = vadd.f32 %v1321_v1, %v1238_v16 }
 0x3fb   : > { %v3854_v2 = vpop.f32.mrf.mxu0 }
 0x3fc   : > { %v1333_v36 = vadd.f32 %v3854_v2, %v1238_v16 }
 0x3fd   : > { %v1324_v3 = vpop.f32.mrf.mxu0 }
 0x3fe   : > { %v1385_v40 = vpack.c.bf16 %v1333_v36, %v1330_v38  ;;  %v1325_v42 = vadd.f32 %v1324_v3, %v1238_v16 }
 0x3ff   : > { %v3857_v4 = vpop.f32.mrf.mxu0 }
 0x400   : > { %v1346_v33 = vadd.f32 %v3857_v4, %v1238_v16  ;;  %v1384_v44 = vpack.c.bf16 %v1325_v42, %v1322_v43 }
 0x401   : > { %v1337_v5 = vpop.f32.mrf.mxu0 }
 0x402   : > { %v1338_v26 = vadd.f32 %v1337_v5, %v1238_v16 }
 0x403   : > { %v3858_v6 = vpop.f32.mrf.mxu0 }
 0x404   : > { %v1349_v32 = vadd.f32 %v3858_v6, %v1238_v16 }
 0x405   : > { %v1340_v39 = vpop.f32.mrf.mxu0 }
 0x406   : > { %v1387_v34 = vpack.c.bf16 %v1349_v32, %v1346_v33  ;;  %v1341_v35 = vadd.f32 %v1340_v39, %v1238_v16  ;;  %v1508_v39 = vsub.s32 3, %v4938_v23 }
 0x407   : > { %v3861_v7 = vpop.f32.mrf.mxu0 }
 0x408   : > { %v1362_v25 = vadd.f32 %v3861_v7, %v1238_v16  ;;  %v1386_v37 = vpack.c.bf16 %v1341_v35, %v1338_v26 }
 0x409   : > { %v1353_v14 = vpop.f32.mrf.mxu0 }
 0x40a   : > { %v1354_v30 = vadd.f32 %v1353_v14, %v1238_v16  ;;  %v5035_v14 = vrot.slane %v4992_v9, %v1508_v39 }
 0x40b   : > { %v3862_v63 = vpop.f32.mrf.mxu0 }
 0x40c   : > { %v1365_v15 = vadd.f32 %v3862_v63, %v1238_v16 }
 0x40d   : > { %v1356_v41 = vpop.f32.mrf.mxu0 }
 0x40e   : > { %v1389_v28 = vpack.c.bf16 %v1365_v15, %v1362_v25  ;;  %v1357_v29 = vadd.f32 %v1356_v41, %v1238_v16 }
 0x40f   : > { %v3865_v8 = vpop.f32.mrf.mxu0 }
 0x410   : > { %v1378_v18 = vadd.f32 %v3865_v8, %v1238_v16  ;;  %v1388_v31 = vpack.c.bf16 %v1357_v29, %v1354_v30 }
 0x411   : > { %v1369_v12 = vpop.f32.mrf.mxu0 }
 0x412   : > { %v1370_v20 = vadd.f32 %v1369_v12, %v1238_v16 }
 0x413   : > { %v3866_v17 = vpop.f32.mrf.mxu0 }
 0x414   : > { %v1381_v0 = vadd.f32 %v3866_v17, %v1238_v16 }
 0x415   : > { %v1372_v19 = vpop.f32.mrf.mxu0 }
 0x416   : > { %v1391_v10 = vpack.c.bf16 %v1381_v0, %v1378_v18  ;;  %v1373_v21 = vadd.f32 %v1372_v19, %v1238_v16 }
 0x417   : > { %v3917_v62 = vpop.f32.mrf.mxu0 }
 0x418   : > { %v1390_v22 = vpack.c.bf16 %v1373_v21, %v1370_v20  ;;  %3867 = vmatprep.subr.bf16.mxu1 %v1391_v10  ;;  %v1601_v17 = vadd.f32 %v3917_v62, %v5035_v14 }
 0x419   : > { %3868 = vmatpush3.bf16.msra.mxu1 %v1391_v10  ;;  %v1592_v11 = vpop.f32.mrf.mxu0 }
 0x41a   : > { %3869 = vmatprep.subr.bf16.mxu1 %v1390_v22  ;;  %v1593_v12 = vadd.f32 %v1592_v11, %v5035_v14 }
 0x41b   : > { %v3918_v1 = vpop.f32.mrf.mxu0 }
 0x41c   : > { %v1604_v16 = vadd.f32 %v3918_v1, %v5035_v14 }
 0x41d   : > { %3870 = vmatpush3.bf16.msra.mxu1 %v1390_v22  ;;  %v1595_v2 = vpop.f32.mrf.mxu0 }
 0x41e   : > { %3871 = vmatprep.subr.bf16.mxu1 %v1389_v28  ;;  %v1596_v0 = vadd.f32 %v1595_v2, %v5035_v14 }
 0x41f   : > { %v3921_v3 = vpop.f32.mrf.mxu0 }
 0x420   : > { %v1617_v36 = vadd.f32 %v3921_v3, %v5035_v14 }
 0x421   : > { %3872 = vmatpush3.bf16.msra.mxu1 %v1389_v28  ;;  %v1608_v4 = vpop.f32.mrf.mxu0 }
 0x422   : > { %3873 = vmatprep.subr.bf16.mxu1 %v1388_v31 }
 0x423   : > { %v3922_v5 = vpop.f32.mrf.mxu0 }
 0x424   : > { %v1620_v35 = vadd.f32 %v3922_v5, %v5035_v14 }
 0x425   : > { %3874 = vmatpush3.bf16.msra.mxu1 %v1388_v31  ;;  %v1611_v6 = vpop.f32.mrf.mxu0 }
 0x426   : > { %3875 = vmatprep.subr.bf16.mxu1 %v1387_v34  ;;  %v1612_v42 = vadd.f32 %v1611_v6, %v5035_v14 }
 0x427   : > { %v3925_v7 = vpop.f32.mrf.mxu0 }
 0x428   : > { %v1633_v6 = vadd.f32 %v3925_v7, %v5035_v14 }
 0x429   : > { %3876 = vmatpush3.bf16.msra.mxu1 %v1387_v34  ;;  %v1624_v41 = vpop.f32.mrf.mxu0  ;;  %v1609_v34 = vadd.f32 %v1608_v4, %v5035_v14 }
 0x42a   : > { %3877 = vmatprep.subr.bf16.mxu1 %v1386_v37  ;;  %v1625_v3 = vadd.f32 %v1624_v41, %v5035_v14 }
 0x42b   : > { %v3926_v10 = vpop.f32.mrf.mxu0 }
 0x42c   : > { %v1636_v4 = vadd.f32 %v3926_v10, %v5035_v14  ;;  %v4257_v10 = vld [vmem:[#allocation11 + $0x98] sm:$0xff]  }
 0x42d   : > { %3878 = vmatpush3.bf16.msra.mxu1 %v1386_v37  ;;  %v1627_v32 = vpop.f32.mrf.mxu0 }
 0x42e   : > { %3879 = vmatprep.subr.bf16.mxu1 %v1385_v40 }
 0x431   : > { %3880 = vmatpush3.bf16.msra.mxu1 %v1385_v40  ;;  %v4254_v40 = vld [vmem:[#allocation11 + $0xb0] sm:$0xff]  }
 0x432   : > { %3881 = vmatprep.subr.bf16.mxu1 %v1384_v44 }
 0x435   : > { %3882 = vmatpush3.bf16.msra.mxu1 %v1384_v44 }
 0x436   : > { %3931 = vmatprep.subr.bf16.mxu1 %v4245_v45 }
 0x438   : > { %3884 = vmatmul.mubr.bf16.vlgmr.msra.gmra.mxu1 %v4968_v48 }
 0x439   : > { %3887 = vmatprep.mubr.bf16.mxu1 %v4970_v49  ;;  %3932 = vmatpush3.bf16.msra.mxu1 %v4245_v45  ;;  %v3929_v45 = vpop.f32.mrf.mxu0 }
 0x43a   : > { %3933 = vmatprep.subr.bf16.mxu1 %v4246_v46 }
 0x43b   : > { %v1640_v11 = vpop.f32.mrf.mxu0 }
 0x43d   : > { %3934 = vmatpush3.bf16.msra.mxu1 %v4246_v46 }
 0x43e   : > { %3935 = vmatprep.subr.bf16.mxu1 %v4247_v47 }
 0x440   : > { %3888 = vmatmul.mubr.bf16.gmra.mxu1 %v4974_v52 }
 0x441   : > { %3891 = vmatprep.mubr.bf16.mxu1 %v4976_v53  ;;  %3936 = vmatpush3.bf16.msra.mxu1 %v4247_v47 }
 0x442   : > { %3937 = vmatprep.subr.bf16.mxu1 %v4248_v50 }
 0x445   : > { %3938 = vmatpush3.bf16.msra.mxu1 %v4248_v50 }
 0x446   : > { %3939 = vmatprep.subr.bf16.mxu1 %v4249_v51 }
 0x448   : > { %3892 = vmatmul.mubr.bf16.gmra.mxu1 %v4980_v57 }
 0x449   : > { %3895 = vmatprep.mubr.bf16.mxu1 %v4982_v58  ;;  %3940 = vmatpush3.bf16.msra.mxu1 %v4249_v51 }
 0x44a   : > { %3941 = vmatprep.subr.bf16.mxu1 %v4250_v54 }
 0x44d   : > { %3942 = vmatpush3.bf16.msra.mxu1 %v4250_v54 }
 0x44e   : > { %3943 = vmatprep.subr.bf16.mxu1 %v4251_v56 }
 0x450   : > { %3896 = vmatmul.mubr.bf16.gmra.mxu1 %v4986_v59 }
 0x451   : > { %3944 = vmatpush3.bf16.msra.mxu1 %v4251_v56  ;;  %v4255_v56 = vld [vmem:[#allocation11 + $0xa8] sm:$0xff]  }
 0x452   : > { %3945 = vmatprep.subr.bf16.mxu1 %v4252_v60 }
 0x455   : > { %3946 = vmatpush3.bf16.msra.mxu1 %v4252_v60 }
 0x456   : > { %3995 = vmatprep.subr.bf16.mxu1 %v4253_v61 }
 0x4f8   : > { %v3885_v63 = vpop.f32.mrf.mxu1 }
 0x4f9   : > { %v1657_v21 = vadd.f32 %v3885_v63, %v1601_v17  ;;  %v3930_v17 = vpop.f32.mrf.mxu0 }
 0x4fa   : > { %v1426_v8 = vpop.f32.mrf.mxu1 }
 0x4fb   : > { %v1655_v19 = vadd.f32 %v1593_v12, %v1426_v8  ;;  %v1673_v31 = vmax.f32 %v1657_v21, 0.0  ;;  %v1628_v8 = vadd.f32 %v1627_v32, %v5035_v14  ;;  %v1649_v32 = vadd.f32 %v3929_v45, %v5035_v14 }
 0x4fc   : > { %v3886_v18 = vpop.f32.mrf.mxu1 }
 0x4fd   : > { %v1658_v20 = vadd.f32 %v3886_v18, %v1604_v16  ;;  %v1671_v29 = vmax.f32 %v1655_v19, 0.0 }
 0x4fe   : > { %v1429_v15 = vpop.f32.mrf.mxu1 }
 0x4ff   : > { %v1656_v22 = vadd.f32 %v1596_v0, %v1429_v15  ;;  %v1674_v25 = vmax.f32 %v1658_v20, 0.0  ;;  %v1643_v15 = vpop.f32.mrf.mxu0 }
 0x500   : > { %v3889_v28 = vpop.f32.mrf.mxu1 }
 0x501   : > { %v1672_v30 = vmax.f32 %v1656_v22, 0.0  ;;  %v5046_v37 = vpack.c.bf16 %v1674_v25, %v1673_v31  ;;  %v1661_v46 = vadd.f32 %v3889_v28, %v1617_v36  ;;  %v1641_v28 = vadd.f32 %v1640_v11, %v5035_v14 }
 0x502   : > { %v1442_v33 = vpop.f32.mrf.mxu1 }
 0x503   : > { %v5043_v26 = vpack.c.bf16 %v1672_v30, %v1671_v29  ;;  %v1659_v43 = vadd.f32 %v1609_v34, %v1442_v33  ;;  %v1677_v1 = vmax.f32 %v1661_v46, 0.0  ;;  %v1652_v29 = vadd.f32 %v3930_v17, %v5035_v14  ;;  %v4258_v34 = vld [vmem:[#allocation11 + $0x90] sm:$0xff]   ;;  %v4259_v46 = vld [vmem:[#allocation11 + $0x88] sm:$0xff]  }
 0x504   : > { %v3890_v38 = vpop.f32.mrf.mxu1 }
 0x505   : > { %v1662_v44 = vadd.f32 %v3890_v38, %v1620_v35  ;;  %3947 = vmatprep.mubr.bf16.mxu1 %v5043_v26  ;;  %v1675_v60 = vmax.f32 %v1659_v43, 0.0  ;;  %v1644_v35 = vadd.f32 %v1643_v15, %v5035_v14 }
 0x506   : > { %v1445_v47 = vpop.f32.mrf.mxu1  ;;  %3948 = vmatmul.mubr.bf16.vlgmr.msra.gmra.mxu1 %v5046_v37 }
 0x507   : > { %v1660_v50 = vadd.f32 %v1612_v42, %v1445_v47  ;;  %3996 = vmatpush3.bf16.msra.mxu1 %v4253_v61  ;;  %v1678_v51 = vmax.f32 %v1662_v44, 0.0  ;;  %v4256_v61 = vld [vmem:[#allocation11 + $0xa0] sm:$0xff]  }
 0x508   : > { %v3893_v54 = vpop.f32.mrf.mxu1  ;;  %3997 = vmatprep.subr.bf16.mxu1 %v4254_v40 }
 0x509   : > { %v1676_v62 = vmax.f32 %v1660_v50, 0.0  ;;  %v1722_v39 = vpack.c.bf16 %v1678_v51, %v1677_v1  ;;  %v1665_v18 = vadd.f32 %v3893_v54, %v1633_v6 }
 0x50a   : > { %v1458_v2 = vpop.f32.mrf.mxu1 }
 0x50b   : > { %v1721_v5 = vpack.c.bf16 %v1676_v62, %v1675_v60  ;;  %3998 = vmatpush3.bf16.msra.mxu1 %v4254_v40  ;;  %v1663_v12 = vadd.f32 %v1625_v3, %v1458_v2  ;;  %v1681_v22 = vmax.f32 %v1665_v18, 0.0 }
 0x50c   : > { %v3894_v63 = vpop.f32.mrf.mxu1  ;;  %3999 = vmatprep.subr.bf16.mxu1 %v4255_v56 }
 0x50d   : > { %v1666_v16 = vadd.f32 %v3894_v63, %v1636_v4  ;;  %3951 = vmatprep.mubr.bf16.mxu1 %v1721_v5  ;;  %v1679_v7 = vmax.f32 %v1663_v12, 0.0 }
 0x50e   : > { %v1461_v0 = vpop.f32.mrf.mxu1  ;;  %3952 = vmatmul.mubr.bf16.gmra.mxu1 %v1722_v39 }
 0x50f   : > { %v1664_v41 = vadd.f32 %v1628_v8, %v1461_v0  ;;  %4000 = vmatpush3.bf16.msra.mxu1 %v4255_v56  ;;  %v1682_v19 = vmax.f32 %v1666_v16, 0.0  ;;  %v4260_v56 = vld [vmem:[#allocation11 + $0x80] sm:$0xff]  }
 0x510   : > { %v3897_v20 = vpop.f32.mrf.mxu1  ;;  %4001 = vmatprep.subr.bf16.mxu1 %v4256_v61 }
 0x511   : > { %v1680_v21 = vmax.f32 %v1664_v41, 0.0  ;;  %v1724_v31 = vpack.c.bf16 %v1682_v19, %v1681_v22  ;;  %v1669_v40 = vadd.f32 %v3897_v20, %v1649_v32 }
 0x512   : > { %v1474_v25 = vpop.f32.mrf.mxu1 }
 0x513   : > { %v1723_v30 = vpack.c.bf16 %v1680_v21, %v1679_v7  ;;  %4002 = vmatpush3.bf16.msra.mxu1 %v4256_v61  ;;  %v1667_v36 = vadd.f32 %v1641_v28, %v1474_v25  ;;  %v1685_v45 = vmax.f32 %v1669_v40, 0.0  ;;  %v1747_v61 = vrot.slane %v4992_v9, %v607_v27 }
 0x514   : > { %v3898_v33 = vpop.f32.mrf.mxu1  ;;  %4003 = vmatprep.subr.bf16.mxu1 %v4257_v10 }
 0x515   : > { %v1670_v38 = vadd.f32 %v3898_v33, %v1652_v29  ;;  %3955 = vmatprep.mubr.bf16.mxu1 %v1723_v30  ;;  %v1683_v47 = vmax.f32 %v1667_v36, 0.0 }
 0x516   : > { %v1477_v42 = vpop.f32.mrf.mxu1  ;;  %3956 = vmatmul.mubr.bf16.gmra.mxu1 %v1724_v31 }
 0x517   : > { %v1668_v43 = vadd.f32 %v1644_v35, %v1477_v42  ;;  %4004 = vmatpush3.bf16.msra.mxu1 %v4257_v10  ;;  %v1686_v44 = vmax.f32 %v1670_v38, 0.0 }
 0x518   : > { %4005 = vmatprep.subr.bf16.mxu1 %v4258_v34 }
 0x519   : > { %v1684_v50 = vmax.f32 %v1668_v43, 0.0  ;;  %v1726_v54 = vpack.c.bf16 %v1686_v44, %v1685_v45 }
 0x51b   : > { %v1725_v51 = vpack.c.bf16 %v1684_v50, %v1683_v47  ;;  %4006 = vmatpush3.bf16.msra.mxu1 %v4258_v34 }
 0x51c   : > { %4007 = vmatprep.subr.bf16.mxu1 %v4259_v46 }
 0x51d   : > { %3959 = vmatprep.mubr.bf16.mxu1 %v1725_v51 }
 0x51e   : > { %3960 = vmatmul.mubr.bf16.gmra.mxu1 %v1726_v54 }
 0x51f   : > { %4008 = vmatpush3.bf16.msra.mxu1 %v4259_v46  ;;  %4011 = vmatprep.mubr.bf16.mxu1 %v5043_v26 }
 0x520   : > { %4009 = vmatprep.subr.bf16.mxu1 %v4260_v56 }
 0x523   : > { %4010 = vmatpush3.bf16.msra.mxu1 %v4260_v56 }
 0x524   : > { %4047 = vmatprep.subr.bf16.mxu1 %v4648_v55 }
 0x526   : > { %4012 = vmatmul.mubr.bf16.vlgmr.msra.gmra.mxu1 %v5046_v37 }
 0x527   : > { %4015 = vmatprep.mubr.bf16.mxu1 %v1721_v5 }
 0x52e   : > { %4016 = vmatmul.mubr.bf16.gmra.mxu1 %v1722_v39 }
 0x52f   : > { %4019 = vmatprep.mubr.bf16.mxu1 %v1723_v30 }
 0x536   : > { %4020 = vmatmul.mubr.bf16.gmra.mxu1 %v1724_v31 }
 0x537   : > { %4023 = vmatprep.mubr.bf16.mxu1 %v1725_v51 }
 0x53e   : > { %4024 = vmatmul.mubr.bf16.gmra.mxu1 %v1726_v54 }
 0x53f   : > { %4063 = vmatprep.mubr.msk.bf16.mxu1 %vm4650_vm1, %v4648_v55 }
 0x5c6   : > { %v3949_v14 = vpop.f32.mrf.mxu1 }
 0x5c7   : > { %v1839_v46 = vadd.f32 %v3949_v14, %v1747_v61  ;;  %v4262_v14 = vld [vmem:[#allocation12 + $0x70] sm:$0xff]  }
 0x5c8   : > { %v1830_v60 = vpop.f32.mrf.mxu1 }
 0x5c9   : > { %v1831_v54 = vadd.f32 %v1830_v60, %v1747_v61  ;;  %v4263_v60 = vld [vmem:[#allocation12 + $0x68] sm:$0xff]  }
 0x5ca   : > { %v3950_v62 = vpop.f32.mrf.mxu1 }
 0x5cb   : > { %v1842_v42 = vadd.f32 %v3950_v62, %v1747_v61 }
 0x5cc   : > { %v1833_v26 = vpop.f32.mrf.mxu1 }
 0x5cd   : > { %v1894_v50 = vpack.c.bf16 %v1842_v42, %v1839_v46  ;;  %v1834_v45 = vadd.f32 %v1833_v26, %v1747_v61  ;;  %v4264_v26 = vld [vmem:[#allocation12 + $0x60] sm:$0xff]   ;;  %v4293_v46 = vld [vmem:[#allocation12 + $0x30] sm:$0xff]  }
 0x5ce   : > { %v3953_v11 = vpop.f32.mrf.mxu1  ;;  %v4286_v42 = vld [vmem:[#allocation14 + $0x40] ss:$8 sps:$4 sm:$0xff]  }
 0x5cf   : > { %v1855_v31 = vadd.f32 %v3953_v11, %v1747_v61  ;;  %v1893_v11 = vpack.c.bf16 %v1834_v45, %v1831_v54  ;;  %v4297_v45 = vld [vmem:[#allocation12 + $0x28] sm:$0xff]   ;;  %v4300_v54 = vld [vmem:[#allocation14 + $0x14] ss:$8 sps:$4 sm:$0xff]  }
 0x5d0   : > { %v1846_v1 = vpop.f32.mrf.mxu1 }
 0x5d1   : > { %v1847_v38 = vadd.f32 %v1846_v1, %v1747_v61 }
 0x5d2   : > { %v3954_v2 = vpop.f32.mrf.mxu1 }
 0x5d3   : > { %v1858_v29 = vadd.f32 %v3954_v2, %v1747_v61 }
 0x5d4   : > { %v1849_v3 = vpop.f32.mrf.mxu1 }
 0x5d5   : > { %v1896_v34 = vpack.c.bf16 %v1858_v29, %v1855_v31  ;;  %v1850_v35 = vadd.f32 %v1849_v3, %v1747_v61  ;;  %v4261_v3 = vld [vmem:[#allocation12 + $0x78] sm:$0xff]   ;;  %v4280_v31 = vld [vmem:[#allocation14 + $0x60] ss:$8 sps:$4 sm:$0xff]  }
 0x5d6   : > { %v3957_v4 = vpop.f32.mrf.mxu1  ;;  %v4277_v29 = vld [vmem:[#allocation14 + $0x70] ss:$8 sps:$4 sm:$0xff]  }
 0x5d7   : > { %v1871_v21 = vadd.f32 %v3957_v4, %v1747_v61  ;;  %v1895_v43 = vpack.c.bf16 %v1850_v35, %v1847_v38  ;;  %v4265_v4 = vld [vmem:[#allocation12 + $0x58] sm:$0xff]   ;;  %v4288_v38 = vld [vmem:[#allocation14 + $0x44] ss:$8 sps:$4 sm:$0xff]  }
 0x5d8   : > { %v1862_v37 = vpop.f32.mrf.mxu1  ;;  %v4283_v35 = vld [vmem:[#allocation14 + $0x50] ss:$8 sps:$4 sm:$0xff]  }
 0x5d9   : > { %v1863_v25 = vadd.f32 %v1862_v37, %v1747_v61  ;;  %v494_v37 = vld [vmem:[%s4912_s2 + $0x8] sm:$0xff]  ;;  %s5232_s2 = scalar_lea.hbm %s5286_s10, %s3530_s4 }
 0x5da   : > { %v3958_v5 = vpop.f32.mrf.mxu1 }
 0x5db   : > { %v1874_v20 = vadd.f32 %v3958_v5, %v1747_v61 }
 0x5dc   : > { %v1865_v6 = vpop.f32.mrf.mxu1 }
 0x5dd   : > { %v1898_v27 = vpack.c.bf16 %v1874_v20, %v1871_v21  ;;  %v1866_v9 = vadd.f32 %v1865_v6, %v1747_v61 }
 0x5de   : > { %v3961_v39 = vpop.f32.mrf.mxu1 }
 0x5df   : > { %v1887_v12 = vadd.f32 %v3961_v39, %v1747_v61  ;;  %v1897_v30 = vpack.c.bf16 %v1866_v9, %v1863_v25  ;;  %v4267_v39 = vld [vmem:[#allocation12 + $0x48] sm:$0xff]   ;;  %v4279_v9 = vld [vmem:[#allocation14 + $0x74] ss:$8 sps:$4 sm:$0xff]  }
 0x5e0   : > { %v1878_v63 = vpop.f32.mrf.mxu1 }
 0x5e1   : > { %v1879_v18 = vadd.f32 %v1878_v63, %v1747_v61 }
 0x5e2   : > { %v3962_v8 = vpop.f32.mrf.mxu1 }
 0x5e3   : > { %v1890_v16 = vadd.f32 %v3962_v8, %v1747_v61  ;;  %v4270_v8 = vld [vmem:[#allocation12 + $0xb0] sm:$0xff]  }
 0x5e4   : > { %v1881_v17 = vpop.f32.mrf.mxu1 }
 0x5e5   : > { %v1900_v0 = vpack.c.bf16 %v1890_v16, %v1887_v12  ;;  %v1882_v41 = vadd.f32 %v1881_v17, %v1747_v61  ;;  %v4268_v61 = vld [vmem:[#allocation12 + $0x40] sm:$0xff]  }
 0x5e6   : > { %v5067_v19 = vpop.f32.mrf.mxu1  ;;  %v4272_v12 = vld [vmem:[#allocation12 + $0xa0] sm:$0xff]  }
 0x5e7   : > { %v1899_v10 = vpack.c.bf16 %v1882_v41, %v1879_v18  ;;  %3963 = vmatprep.subr.bf16.mxu0 %v1900_v0  ;;  %v4273_v18 = vld [vmem:[#allocation12 + $0x98] sm:$0xff]   ;;  %v4274_v41 = vld [vmem:[#allocation12 + $0x90] sm:$0xff]  }
 0x5e8   : > { %3964 = vmatpush3.bf16.msra.mxu0 %v1900_v0  ;;  %v5069_v7 = vpop.f32.mrf.mxu1 }
 0x5e9   : > { %3965 = vmatprep.subr.bf16.mxu0 %v1899_v10 }
 0x5ea   : > { %v5071_v15 = vpop.f32.mrf.mxu1 }
 0x5ec   : > { %3966 = vmatpush3.bf16.msra.mxu0 %v1899_v10  ;;  %v5073_v22 = vpop.f32.mrf.mxu1  ;;  %v4275_v10 = vld [vmem:[#allocation12 + $0x88] sm:$0xff]  }
 0x5ed   : > { %3967 = vmatprep.subr.bf16.mxu0 %v1898_v27 }
 0x5ee   : > { %v5075_v28 = vpop.f32.mrf.mxu1 }
 0x5f0   : > { %3968 = vmatpush3.bf16.msra.mxu0 %v1898_v27  ;;  %v5077_v32 = vpop.f32.mrf.mxu1  ;;  %v4276_v27 = vld [vmem:[#allocation12 + $0x80] sm:$0xff]  }
 0x5f1   : > { %3969 = vmatprep.subr.bf16.mxu0 %v1897_v30 }
 0x5f2   : > { %v5079_v33 = vpop.f32.mrf.mxu1 }
 0x5f4   : > { %3970 = vmatpush3.bf16.msra.mxu0 %v1897_v30  ;;  %v5081_v36 = vpop.f32.mrf.mxu1  ;;  %v4282_v30 = vld [vmem:[#allocation14 + $0x64] ss:$8 sps:$4 sm:$0xff]  }
 0x5f5   : > { %3971 = vmatprep.subr.bf16.mxu0 %v1896_v34 }
 0x5f6   : > { %v4021_v40 = vpop.f32.mrf.mxu1 }
 0x5f7   : > { %v4289_v40 = vld [vmem:[#allocation12 + $0x38] sm:$0xff]  }
 0x5f8   : > { %3972 = vmatpush3.bf16.msra.mxu0 %v1896_v34  ;;  %v5083_v44 = vpop.f32.mrf.mxu1  ;;  %v4285_v34 = vld [vmem:[#allocation14 + $0x54] ss:$8 sps:$4 sm:$0xff]   ;;  %4048 = vmatpush3.bf16.msra.mxu1 %v4289_v40 }
 0x5f9   : > { %3973 = vmatprep.subr.bf16.mxu0 %v1895_v43  ;;  %4049 = vmatprep.subr.bf16.mxu1 %v4648_v55 }
 0x5fa   : > { %v4022_v47 = vpop.f32.mrf.mxu1 }
 0x5fb   : > { %v4290_v47 = vld [vmem:[#allocation14 + $0x30] ss:$8 sps:$4 sm:$0xff]  }
 0x5fc   : > { %3974 = vmatpush3.bf16.msra.mxu0 %v1895_v43  ;;  %v2136_v51 = vpop.f32.mrf.mxu1  ;;  %v4292_v43 = vld [vmem:[#allocation14 + $0x34] ss:$8 sps:$4 sm:$0xff]   ;;  %4050 = vmatpush3.bf16.msra.mxu1 %v4293_v46 }
 0x5fd   : > { %3975 = vmatprep.subr.bf16.mxu0 %v1894_v50  ;;  %4051 = vmatprep.subr.bf16.mxu1 %v4648_v55  ;;  %v4294_v51 = vld [vmem:[#allocation14 + $0x20] ss:$8 sps:$4 sm:$0xff]  }
 0x5fe   : > { %v4025_v56 = vpop.f32.mrf.mxu1 }
 0x5ff   : > { %v4301_v56 = vld [vmem:[#allocation12 + $0x20] sm:$0xff]  }
 0x600   : > { %3976 = vmatpush3.bf16.msra.mxu0 %v1894_v50  ;;  %v2149_v1 = vpop.f32.mrf.mxu1  ;;  %v4296_v50 = vld [vmem:[#allocation14 + $0x24] ss:$8 sps:$4 sm:$0xff]   ;;  %4052 = vmatpush3.bf16.msra.mxu1 %v4297_v45 }
 0x601   : > { %3977 = vmatprep.subr.bf16.mxu0 %v1893_v11  ;;  %4053 = vmatprep.subr.bf16.mxu1 %v4648_v55  ;;  %v4304_v1 = vld [vmem:[#allocation14 + $0x4] ss:$8 sps:$4 sm:$0xff]  }
 0x602   : > { %v4026_v2 = vpop.f32.mrf.mxu1 }
 0x603   : > { %v4305_v2 = vld [vmem:[#allocation12 + $0x18] sm:$0xff]  }
 0x604   : > { %3978 = vmatpush3.bf16.msra.mxu0 %v1893_v11  ;;  %v2152_v62 = vpop.f32.mrf.mxu1  ;;  %v4298_v11 = vld [vmem:[#allocation14 + $0x10] ss:$8 sps:$4 sm:$0xff]   ;;  %4054 = vmatpush3.bf16.msra.mxu1 %v4301_v56 }
 0x605   : > { %4027 = vmatprep.subr.bf16.mxu0 %v4648_v55  ;;  %4055 = vmatprep.subr.bf16.mxu1 %v4648_v55  ;;  %v4651_v62 = vmov 0  }
 0x607   : > { %3980 = vmatmul.mubr.bf16.vlgmr.msra.gmra.mxu0 %v4968_v48  ;;  %v4373_v48 = vld [vmem:[%s5285_s9] sm:$0xff] }
 0x608   : > { %3983 = vmatprep.mubr.bf16.mxu0 %v4970_v49  ;;  %4028 = vmatpush3.bf16.msra.mxu0 %v4261_v3  ;;  %v2237_v49 = vrot.slane %v4373_v48, 3  ;;  %v2245_v17 = vrot.slane %v4373_v48, 5  ;;  %v4302_v3 = vld [vmem:[#allocation14] ss:$8 sps:$4 sm:$0xff]  }
 0x609   : > { %4029 = vmatprep.subr.bf16.mxu0 %v4648_v55  ;;  %4056 = vmatpush3.bf16.msra.mxu1 %v4305_v2 }
 0x60a   : > { %v2239_v5 = vmul.f32 %v2237_v49, %v494_v37  ;;  %4057 = vmatprep.subr.bf16.mxu1 %v4648_v55  ;;  %v2017_v49 = vsub.s32 4, %v4938_v23 }
 0x60c   : > { %4030 = vmatpush3.bf16.msra.mxu0 %v4262_v14  ;;  %v4306_v14 = vld [vmem:[#allocation12 + $0x10] sm:$0xff]  }
 0x60d   : > { %4031 = vmatprep.subr.bf16.mxu0 %v4648_v55  ;;  %4058 = vmatpush3.bf16.msra.mxu1 %v4306_v14 }
 0x60e   : > { %4059 = vmatprep.subr.bf16.mxu1 %v4648_v55 }
 0x60f   : > { %3984 = vmatmul.mubr.bf16.gmra.mxu0 %v4974_v52  ;;  %v2240_v52 = vrot.slane %v4373_v48, 4  ;;  %v4311_v48 = vld [vmem:[#allocation14 + $0xf4] ss:$8 sps:$4 sm:$0xff]  }
 0x610   : > { %3987 = vmatprep.mubr.bf16.mxu0 %v4976_v53  ;;  %4032 = vmatpush3.bf16.msra.mxu0 %v4263_v60  ;;  %v4266_v53 = vld [vmem:[#allocation12 + $0x50] sm:$0xff]   ;;  %v4307_v60 = vld [vmem:[#allocation12 + $0x8] sm:$0xff]  }
 0x611   : > { %4033 = vmatprep.subr.bf16.mxu0 %v4648_v55  ;;  %v2242_v6 = vadd.f32 %v2240_v52, %v2239_v5  ;;  %v2244_v16 = vmul.f32 %v2240_v52, %v494_v37  ;;  %4060 = vmatpush3.bf16.msra.mxu1 %v4307_v60  ;;  %v5136_v37 = vld [vmem:[%s5285_s9 + $0x10] sm:$0xff] }
 0x612   : > { %4061 = vmatprep.subr.bf16.mxu1 %v4648_v55  ;;  %v2018_v5 = vrot.slane %v5136_v37, %v2017_v49 }
 0x613   : > { %v2243_v63 = vmax.f32 %v2242_v6, 0.0  ;;  %v2247_v0 = vadd.f32 %v2245_v17, %v2244_v16 }
 0x614   : > { %4034 = vmatpush3.bf16.msra.mxu0 %v4264_v26  ;;  %v4308_v26 = vld [vmem:[#allocation12] sm:$0xff]   ;;  %v2118_v16 = vadd.f32 %v5077_v32, %v2018_v5  ;;  %v2134_v40 = vadd.f32 %v5083_v44, %v2018_v5 }
 0x615   : > { %4035 = vmatprep.subr.bf16.mxu0 %v4648_v55  ;;  %v2248_v20 = vmax.f32 %v2247_v0, 0.0  ;;  %4062 = vmatpush3.bf16.msra.mxu1 %v4308_v26 }
 0x616   : > { %2689 = vmatprep.subr.bf16.mxu1 %v4311_v48 }
 0x617   : > { %3988 = vmatmul.mubr.bf16.gmra.mxu0 %v4980_v57  ;;  %v5106_v57 = vpack.c.bf16 %v2243_v63, %v2243_v63  ;;  %v5118_v21 = vpack.c.bf16 %v2248_v20, %v2248_v20 }
 0x618   : > { %4036 = vmatpush3.bf16.msra.mxu0 %v4265_v4  ;;  %3991 = vmatprep.mubr.bf16.mxu0 %v4982_v58  ;;  %v4269_v58 = vld [vmem:[#allocation12 + $0xb8] sm:$0xff]  }
 0x619   : > { %4037 = vmatprep.subr.bf16.mxu0 %v4648_v55  ;;  %v2479_v25 = vshrl.u32 %v5118_v21, 16  ;;  %v4361_v21 = vld [vmem:[%s5284_s8 + $0x68] sm:$0xff]  }
 0x61c   : > { %4038 = vmatpush3.bf16.msra.mxu0 %v4266_v53  ;;  %v2102_v53 = vadd.f32 %v5069_v7, %v2018_v5 }
 0x61d   : > { %4039 = vmatprep.subr.bf16.mxu0 %v4648_v55 }
 0x61f   : > { %3992 = vmatmul.mubr.bf16.gmra.mxu0 %v4986_v59  ;;  %v4271_v59 = vld [vmem:[#allocation12 + $0xa8] sm:$0xff]  }
 0x620   : > { %4040 = vmatpush3.bf16.msra.mxu0 %v4267_v39  ;;  %4043 = vmatprep.mubr.msk.bf16.mxu0 %vm4650_vm1, %v4648_v55  ;;  %v2110_v39 = vadd.f32 %v5067_v19, %v2018_v5  ;;  %v2126_v19 = vadd.f32 %v5075_v28, %v2018_v5 }
 0x621   : > { %4041 = vmatprep.subr.bf16.mxu0 %v4648_v55 }
 0x624   : > { %4042 = vmatpush3.bf16.msra.mxu0 %v4268_v61 }
 0x625   : > { %4067 = vmatprep.subr.bf16.mxu0 %v4648_v55 }
 0x627   : > { %4044 = vmatmul.mubr.bf16.vlgmr.msra.gmra.mxu0 %v5106_v57 }
 0x628   : > { %4068 = vmatpush3.bf16.msra.mxu0 %v4269_v58  ;;  %4083 = vmatprep.mubr.msk.bf16.mxu0 %vm4650_vm1, %v4648_v55  ;;  %v2113_v58 = vadd.f32 %v5071_v15, %v2018_v5  ;;  %v2129_v15 = vadd.f32 %v5079_v33, %v2018_v5 }
 0x629   : > { %4069 = vmatprep.subr.bf16.mxu0 %v4648_v55 }
 0x62c   : > { %4070 = vmatpush3.bf16.msra.mxu0 %v4270_v8 }
 0x62d   : > { %4071 = vmatprep.subr.bf16.mxu0 %v4648_v55 }
 0x630   : > { %4072 = vmatpush3.bf16.msra.mxu0 %v4271_v59 }
 0x631   : > { %4073 = vmatprep.subr.bf16.mxu0 %v4648_v55 }
 0x634   : > { %4074 = vmatpush3.bf16.msra.mxu0 %v4272_v12 }
 0x635   : > { %4075 = vmatprep.subr.bf16.mxu0 %v4648_v55 }
 0x638   : > { %4076 = vmatpush3.bf16.msra.mxu0 %v4273_v18 }
 0x639   : > { %4077 = vmatprep.subr.bf16.mxu0 %v4648_v55 }
 0x63c   : > { %4078 = vmatpush3.bf16.msra.mxu0 %v4274_v41 }
 0x63d   : > { %4079 = vmatprep.subr.bf16.mxu0 %v4648_v55 }
 0x640   : > { %4080 = vmatpush3.bf16.msra.mxu0 %v4275_v10 }
 0x641   : > { %4081 = vmatprep.subr.bf16.mxu0 %v4648_v55  ;;  %v2105_v55 = vadd.f32 %v5073_v22, %v2018_v5  ;;  %v2121_v22 = vadd.f32 %v5081_v36, %v2018_v5 }
 0x644   : > { %4082 = vmatpush3.bf16.msra.mxu0 %v4276_v27 }
 0x645   : > { %2818 = vmatprep.subr.bf16.mxu0 %v4279_v9 }
 0x647   : > { %4084 = vmatmul.mubr.bf16.vlgmr.msra.gmra.mxu0 %v2479_v25 }
 0x648   : > { %2819 = vmatpush1.bf16.msra.mxu0 %v4277_v29  ;;  %2850 = vmatprep.mubr.bf16.mxu0 %v4651_v62 }
 0x649   : > { %2820 = vmatprep.subr.bf16.mxu0 %v4282_v30 }
 0x64c   : > { %2821 = vmatpush1.bf16.msra.mxu0 %v4280_v31 }
 0x64d   : > { %2822 = vmatprep.subr.bf16.mxu0 %v4285_v34 }
 0x650   : > { %2823 = vmatpush1.bf16.msra.mxu0 %v4283_v35 }
 0x651   : > { %2824 = vmatprep.subr.bf16.mxu0 %v4288_v38 }
 0x654   : > { %2825 = vmatpush1.bf16.msra.mxu0 %v4286_v42 }
 0x655   : > { %2826 = vmatprep.subr.bf16.mxu0 %v4292_v43 }
 0x658   : > { %2827 = vmatpush1.bf16.msra.mxu0 %v4290_v47 }
 0x659   : > { %2828 = vmatprep.subr.bf16.mxu0 %v4296_v50 }
 0x65c   : > { %2829 = vmatpush1.bf16.msra.mxu0 %v4294_v51 }
 0x65d   : > { %2830 = vmatprep.subr.bf16.mxu0 %v4300_v54 }
 0x660   : > { %2831 = vmatpush1.bf16.msra.mxu0 %v4298_v11 }
 0x661   : > { %2832 = vmatprep.subr.bf16.mxu0 %v4304_v1 }
 0x664   : > { %2833 = vmatpush1.bf16.msra.mxu0 %v4302_v3 }
 0x6c7   : > { %v3981_v4 = vpop.f32.mrf.mxu0 }
 0x6c8   : > { %v2166_v8 = vadd.f32 %v3981_v4, %v2110_v39 }
 0x6c9   : > { %v1935_v52 = vpop.f32.mrf.mxu0 }
 0x6ca   : > { %v2164_v63 = vadd.f32 %v2102_v53, %v1935_v52  ;;  %v2182_v20 = vmax.f32 %v2166_v8, 0.0  ;;  %v4312_v8 = vld [vmem:[#allocation14 + $0xe0] ss:$8 sps:$4 sm:$0xff]  }
 0x6cb   : > { %v3982_v6 = vpop.f32.mrf.mxu0 }
 0x6cc   : > { %v2180_v17 = vmax.f32 %v2164_v63, 0.0  ;;  %v2167_v18 = vadd.f32 %v3982_v6, %v2113_v58  ;;  %v4314_v58 = vld [vmem:[#allocation14 + $0xe4] ss:$8 sps:$4 sm:$0xff]  }
 0x6cd   : > { %v1938_v61 = vpop.f32.mrf.mxu0 }
 0x6ce   : > { %v2165_v59 = vadd.f32 %v2105_v55, %v1938_v61  ;;  %v2183_v9 = vmax.f32 %v2167_v18, 0.0  ;;  %v4309_v55 = vld [vmem:[#allocation14 + $0xf0] ss:$8 sps:$4 sm:$0xff]   ;;  %v4323_v18 = vld [vmem:[#allocation14 + $0xb4] ss:$8 sps:$4 sm:$0xff]  }
 0x6cf   : > { %v3985_v12 = vpop.f32.mrf.mxu0 }
 0x6d0   : > { %v2181_v0 = vmax.f32 %v2165_v59, 0.0  ;;  %v2170_v31 = vadd.f32 %v3985_v12, %v2126_v19  ;;  %v4317_v59 = vld [vmem:[#allocation14 + $0xd4] ss:$8 sps:$4 sm:$0xff]   ;;  %v4315_v12 = vld [vmem:[#allocation14 + $0xd0] ss:$8 sps:$4 sm:$0xff]  }
 0x6d1   : > { %v1951_v41 = vpop.f32.mrf.mxu0 }
 0x6d2   : > { %v2221_v7 = vadd.f32 %v2181_v0, %v2180_v17  ;;  %v2168_v10 = vadd.f32 %v2118_v16, %v1951_v41  ;;  %v2186_v50 = vmax.f32 %v2170_v31, 0.0  ;;  %v4320_v16 = vld [vmem:[#allocation14 + $0xc4] ss:$8 sps:$4 sm:$0xff]   ;;  %v4318_v17 = vld [vmem:[#allocation14 + $0xc0] ss:$8 sps:$4 sm:$0xff]  }
 0x6d3   : > { %v3986_v27 = vpop.f32.mrf.mxu0  ;;  %v4321_v0 = vld [vmem:[#allocation14 + $0xb0] ss:$8 sps:$4 sm:$0xff]   ;;  %v4326_v41 = vld [vmem:[#allocation14 + $0xa4] ss:$8 sps:$4 sm:$0xff]  }
 0x6d4   : > { %v2222_v29 = vadd.f32 %v2221_v7, %v2182_v20  ;;  %v2184_v34 = vmax.f32 %v2168_v10, 0.0  ;;  %v2171_v43 = vadd.f32 %v3986_v27, %v2129_v15  ;;  %v4324_v20 = vld [vmem:[#allocation14 + $0xa0] ss:$8 sps:$4 sm:$0xff]   ;;  %v4329_v7 = vld [vmem:[#allocation14 + $0x94] ss:$8 sps:$4 sm:$0xff]  }
 0x6d5   : > { %v1954_v30 = vpop.f32.mrf.mxu0  ;;  %v4327_v10 = vld [vmem:[#allocation14 + $0x90] ss:$8 sps:$4 sm:$0xff]   ;;  %v4332_v27 = vld [vmem:[#allocation14 + $0x84] ss:$8 sps:$4 sm:$0xff]  }
 0x6d6   : > { %v2223_v32 = vadd.f32 %v2222_v29, %v2183_v9  ;;  %v2169_v35 = vadd.f32 %v2121_v22, %v1954_v30  ;;  %v2187_v51 = vmax.f32 %v2171_v43, 0.0  ;;  %v4330_v22 = vld [vmem:[#allocation14 + $0x80] ss:$8 sps:$4 sm:$0xff]   ;;  %v4335_v29 = vld [vmem:[#allocation14 + $0x174] ss:$8 sps:$4 sm:$0xff]  }
 0x6d7   : > { %v3989_v38 = vpop.f32.mrf.mxu0  ;;  %v4333_v30 = vld [vmem:[#allocation14 + $0x170] ss:$8 sps:$4 sm:$0xff]   ;;  %v4347_v43 = vld [vmem:[#allocation14 + $0x134] ss:$8 sps:$4 sm:$0xff]  }
 0x6d8   : > { %v2224_v42 = vadd.f32 %v2223_v32, %v2184_v34  ;;  %v2185_v46 = vmax.f32 %v2169_v35, 0.0  ;;  %v4338_v34 = vld [vmem:[#allocation14 + $0x164] ss:$8 sps:$4 sm:$0xff]   ;;  %v4336_v32 = vld [vmem:[#allocation14 + $0x160] ss:$8 sps:$4 sm:$0xff]  }
 0x6d9   : > { %v1967_v47 = vpop.f32.mrf.mxu0  ;;  %v4341_v35 = vld [vmem:[#allocation14 + $0x154] ss:$8 sps:$4 sm:$0xff]   ;;  %v4339_v38 = vld [vmem:[#allocation14 + $0x150] ss:$8 sps:$4 sm:$0xff]  }
 0x6da   : > { %v2225_v28 = vadd.f32 %v2224_v42, %v2185_v46  ;;  %v2172_v45 = vadd.f32 %v2134_v40, %v1967_v47  ;;  %v4344_v40 = vld [vmem:[#allocation14 + $0x144] ss:$8 sps:$4 sm:$0xff]   ;;  %v4342_v42 = vld [vmem:[#allocation14 + $0x140] ss:$8 sps:$4 sm:$0xff]   ;;  %v4345_v46 = vld [vmem:[#allocation14 + $0x130] ss:$8 sps:$4 sm:$0xff]  }
 0x6db   : > { %v3990_v36 = vpop.f32.mrf.mxu0  ;;  %v4350_v47 = vld [vmem:[#allocation14 + $0x124] ss:$8 sps:$4 sm:$0xff]  }
 0x6dc   : > { %v2226_v54 = vadd.f32 %v2225_v28, %v2186_v50  ;;  %v2188_v56 = vmax.f32 %v2172_v45, 0.0  ;;  %v4353_v50 = vld [vmem:[#allocation14 + $0x114] ss:$8 sps:$4 sm:$0xff]   ;;  %v4356_v28 = vld [vmem:[#allocation14 + $0x104] ss:$8 sps:$4 sm:$0xff]  }
 0x6dd   : > { %v1970_v33 = vpop.f32.mrf.mxu0  ;;  %v4354_v45 = vld [vmem:[#allocation14 + $0x100] ss:$8 sps:$4 sm:$0xff]   ;;  %v4357_v36 = vld [vmem:[%s5284_s8 + $0x78] sm:$0xff]  }
 0x6de   : > { %v2227_v11 = vadd.f32 %v2226_v54, %v2187_v51  ;;  %v2575_v1 = vpack.c.bf16 %v2188_v56, %v2188_v56  ;;  %v4358_v51 = vld [vmem:[%s5284_s8 + $0x38] sm:$0xff]   ;;  %v4359_v54 = vld [vmem:[%s5284_s8 + $0x70] sm:$0xff]   ;;  %3707 = vmatprep.subr.bf16.mxu0 %v4357_v36  ;;  %v4363_v33 = vld [vmem:[%s5284_s8 + $0x60] sm:$0xff]  }
 0x6df   : > { %v3993_v2 = vpop.f32.mrf.mxu0  ;;  %v4360_v56 = vld [vmem:[%s5284_s8 + $0x30] sm:$0xff]  }
 0x6e0   : > { %v2228_v3 = vrot.slane %v2227_v11, 4  ;;  %2851 = vmatmul.mubr.bf16.vlgmr.msra.gmra.mxu0 %v2575_v1  ;;  %v4365_v1 = vld [vmem:[%s5284_s8 + $0x58] sm:$0xff]  }
 0x6e1   : > { %v1983_v14 = vpop.f32.mrf.mxu0  ;;  %3708 = vmatpush3.bf16.msra.mxu0 %v4358_v51  ;;  %v4366_v2 = vld [vmem:[%s5284_s8 + $0x18] sm:$0xff]  }
 0x6e2   : > { %v2229_v60 = vadd.f32 %v2228_v3, %v2227_v11  ;;  %3709 = vmatprep.subr.bf16.mxu0 %v4359_v54  ;;  %v4364_v11 = vld [vmem:[%s5284_s8 + $0x20] sm:$0xff]   ;;  %v4367_v3 = vld [vmem:[%s5284_s8 + $0x50] sm:$0xff]  }
 0x6e3   : > { %v3994_v44 = vpop.f32.mrf.mxu0  ;;  %v4368_v14 = vld [vmem:[%s5284_s8 + $0x10] sm:$0xff]  }
 0x6e4   : > { %v2230_v26 = vrot.slane %v2229_v60, 2  ;;  %v4370_v44 = vld [vmem:[%s5284_s8 + $0x8] sm:$0xff]  }
 0x6e5   : > { %v1986_v48 = vpop.f32.mrf.mxu0  ;;  %3710 = vmatpush3.bf16.msra.mxu0 %v4360_v56 }
 0x6e6   : > { %v2231_v49 = vadd.f32 %v2230_v26, %v2229_v60  ;;  %3711 = vmatprep.subr.bf16.mxu0 %v4361_v21  ;;  %v4369_v60 = vld [vmem:[%s5284_s8 + $0x48] sm:$0xff]   ;;  %v4371_v26 = vld [vmem:[%s5284_s8 + $0x40] sm:$0xff]  }
 0x6e7   : > { %v5148_v4 = vpop.f32.mrf.mxu0  ;;  %v4372_v48 = vld [vmem:[%s5284_s8] sm:$0xff]  }
 0x6e8   : > { %v2232_v5 = vrot.slane %v2231_v49, 1 }
 0x6e9   : > { %v4045_v52 = vpop.f32.mrf.mxu0 }
 0x6ea   : > { %v2233_v53 = vadd.f32 %v2232_v5, %v2231_v49 }
 0x6eb   : > { %v2370_v6 = vpop.f32.mrf.mxu0 }
 0x6ec   : > { %v2235_v39 = vmul.f32 0.015625, %v2233_v53 }
 0x6ed   : > { %v4046_v63 = vpop.f32.mrf.mxu0 }
 0x6ee   : > { %v2249_v61 = vpack.c.bf16 %v2235_v39, %v2235_v39 }
 0x6f0   : > { %4064 = vmatmul.mubr.bf16.vlgmr.msra.gmra.mxu1 %v2249_v61 }
 0x6f1   : > { %2690 = vmatpush1.bf16.msra.mxu1 %v4309_v55  ;;  %2721 = vmatprep.mubr.bf16.mxu1 %v4651_v62  ;;  %v2572_v55 = vrot.slane %v5136_v37, 5 }
 0x6f2   : > { %2691 = vmatprep.subr.bf16.mxu1 %v4314_v58 }
 0x6f5   : > { %2692 = vmatpush1.bf16.msra.mxu1 %v4312_v8 }
 0x6f6   : > { %2693 = vmatprep.subr.bf16.mxu1 %v4317_v59 }
 0x6f9   : > { %2694 = vmatpush1.bf16.msra.mxu1 %v4315_v12 }
 0x6fa   : > { %2695 = vmatprep.subr.bf16.mxu1 %v4320_v16 }
 0x6fd   : > { %2696 = vmatpush1.bf16.msra.mxu1 %v4318_v17 }
 0x6fe   : > { %2697 = vmatprep.subr.bf16.mxu1 %v4323_v18 }
 0x701   : > { %2698 = vmatpush1.bf16.msra.mxu1 %v4321_v0 }
 0x702   : > { %2699 = vmatprep.subr.bf16.mxu1 %v4326_v41  ;;  %v3009_v41 = vsub.s32 6, %v4938_v23 }
 0x705   : > { %2700 = vmatpush1.bf16.msra.mxu1 %v4324_v20 }
 0x706   : > { %2701 = vmatprep.subr.bf16.mxu1 %v4329_v7 }
 0x707   : > { %v5151_v19 = vpop.f32.mrf.mxu0 }
 0x709   : > { %2702 = vmatpush1.bf16.msra.mxu1 %v4327_v10  ;;  %v4085_v9 = vpop.f32.mrf.mxu0  ;;  %v492_v10 = vld [vmem:[%s5285_s9 + $0x18] sm:$0xff] }
 0x70a   : > { %2703 = vmatprep.subr.bf16.mxu1 %v4332_v27 }
 0x70b   : > { %v2567_v15 = vpop.f32.mrf.mxu0 }
 0x70d   : > { %2704 = vmatpush1.bf16.msra.mxu1 %v4330_v22  ;;  %v4086_v31 = vpop.f32.mrf.mxu0  ;;  %v3010_v22 = vrot.slane %v5136_v37, %v3009_v41 }
 0x70e   : > { %2956 = vmatprep.subr.bf16.mxu1 %v4335_v29  ;;  %v3014_v31 = vrot.slane %v492_v10, %v3009_v41 }
 0x710   : > { %2722 = vmatmul.mubr.bf16.vlgmr.msra.gmra.mxu1 %v5106_v57  ;;  %v4348_v57 = vld [vmem:[#allocation14 + $0x120] ss:$8 sps:$4 sm:$0xff]  }
 0x711   : > { %2957 = vmatpush1.bf16.msra.mxu1 %v4333_v30  ;;  %2988 = vmatprep.mubr.bf16.mxu1 %v4651_v62  ;;  %v4351_v62 = vld [vmem:[#allocation14 + $0x110] ss:$8 sps:$4 sm:$0xff]  }
 0x712   : > { %2958 = vmatprep.subr.bf16.mxu1 %v4338_v34 }
 0x715   : > { %2959 = vmatpush1.bf16.msra.mxu1 %v4336_v32 }
 0x716   : > { %2960 = vmatprep.subr.bf16.mxu1 %v4341_v35 }
 0x719   : > { %2961 = vmatpush1.bf16.msra.mxu1 %v4339_v38 }
 0x71a   : > { %2962 = vmatprep.subr.bf16.mxu1 %v4344_v40 }
 0x71d   : > { %2963 = vmatpush1.bf16.msra.mxu1 %v4342_v42 }
 0x71e   : > { %2964 = vmatprep.subr.bf16.mxu1 %v4347_v43 }
 0x721   : > { %2965 = vmatpush1.bf16.msra.mxu1 %v4345_v46 }
 0x722   : > { %2966 = vmatprep.subr.bf16.mxu1 %v4350_v47 }
 0x725   : > { %2967 = vmatpush1.bf16.msra.mxu1 %v4348_v57 }
 0x726   : > { %2968 = vmatprep.subr.bf16.mxu1 %v4353_v50 }
 0x729   : > { %2969 = vmatpush1.bf16.msra.mxu1 %v4351_v62 }
 0x72a   : > { %2970 = vmatprep.subr.bf16.mxu1 %v4356_v28 }
 0x72d   : > { %2971 = vmatpush1.bf16.msra.mxu1 %v4354_v45 }
 0x730   : > { %2989 = vmatmul.mubr.bf16.vlgmr.msra.gmra.mxu1 %v2479_v25  ;;  %v4362_v25 = vld [vmem:[%s5284_s8 + $0x28] sm:$0xff]  }
 0x731   : > { %3712 = vmatpush3.bf16.msra.mxu0 %v4362_v25 }
 0x732   : > { %3713 = vmatprep.subr.bf16.mxu0 %v4363_v33 }
 0x735   : > { %3714 = vmatpush3.bf16.msra.mxu0 %v4364_v11 }
 0x736   : > { %3715 = vmatprep.subr.bf16.mxu0 %v4365_v1 }
 0x739   : > { %3716 = vmatpush3.bf16.msra.mxu0 %v4366_v2 }
 0x73a   : > { %3717 = vmatprep.subr.bf16.mxu0 %v4367_v3 }
 0x73d   : > { %3718 = vmatpush3.bf16.msra.mxu0 %v4368_v14 }
 0x73e   : > { %3719 = vmatprep.subr.bf16.mxu0 %v4369_v60 }
 0x741   : > { %3720 = vmatpush3.bf16.msra.mxu0 %v4370_v44 }
 0x742   : > { %3721 = vmatprep.subr.bf16.mxu0 %v4371_v26 }
 0x745   : > { %3722 = vmatpush3.bf16.msra.mxu0 %v4372_v48 }
 0x7a0   : > { %v2852_v49 = vpop.f32.mrf.mxu0 }
 0x7a2   : > { %v2854_v5 = vpop.f32.mrf.mxu0 }
 0x7a4   : > { %v2856_v52 = vpop.f32.mrf.mxu0 }
 0x7a6   : > { %v2857_v53 = vpop.f32.mrf.mxu0 }
 0x7b0   : > { %v2455_v6 = vpop.f32.mrf.mxu1 }
 0x7b1   : > { %v2456_v39 = vadd.f32 %v2455_v6, %v5148_v4 }
 0x7b2   : > { %v4065_v63 = vpop.f32.mrf.mxu1 }
 0x7b3   : > { %v2570_v61 = vadd.f32 %v5151_v19, %v2456_v39 }
 0x7b4   : > { %v2458_v58 = vpop.f32.mrf.mxu1 }
 0x7b5   : > { %v2574_v8 = vadd.f32 %v2572_v55, %v2570_v61 }
 0x7b6   : > { %v4066_v59 = vpop.f32.mrf.mxu1 }
 0x7b7   : > { %v3194_v12 = vmax.f32 %v2574_v8, 0.0 }
 0x7b9   : > { %3195 = vst [vmem:[%s5210_s24 + $0x8] sm:$0x1] %v3194_v12 }
 0x7d0   : > { %v2723_v16 = vpop.f32.mrf.mxu1 }
 0x7d1   : > { %v2733_v4 = vrot.slane %v2723_v16, %v4941_v24 }
 0x7d2   : > { %v2725_v17 = vpop.f32.mrf.mxu1 }
 0x7d3   : > { %v2737_v20 = vrot.slane %v2725_v17, %v4941_v24  ;;  %v2853_v27 = vadd.f32 %v2852_v49, %v2733_v4 }
 0x7d4   : > { %v2727_v18 = vpop.f32.mrf.mxu1 }
 0x7d5   : > { %v2855_v29 = vadd.f32 %v2854_v5, %v2737_v20 }
 0x7d6   : > { %v2728_v0 = vpop.f32.mrf.mxu1 }
 0x7f0   : > { %v2990_v7 = vpop.f32.mrf.mxu1 }
 0x7f1   : > { %v3000_v19 = vrot.slane %v2990_v7, %v4941_v24 }
 0x7f2   : > { %v2992_v9 = vpop.f32.mrf.mxu1 }
 0x7f3   : > { %v3005_v15 = vadd.f32 %v3000_v19, %v2853_v27  ;;  %v3004_v30 = vrot.slane %v2992_v9, %v4941_v24  ;;  %v3056_v24 = vrot.slane %v5136_v37, %v681_v13 }
 0x7f4   : > { %v2994_v34 = vpop.f32.mrf.mxu1 }
 0x7f5   : > { %v3015_v32 = vadd.f32 %v3010_v22, %v3005_v15  ;;  %v3006_v35 = vadd.f32 %v3004_v30, %v2855_v29 }
 0x7f6   : > { %v2995_v38 = vpop.f32.mrf.mxu1 }
 0x7f7   : > { %v3016_v40 = vadd.f32 %v3014_v31, %v3006_v35  ;;  %v3017_v42 = vmax.f32 %v3015_v32, 0.0 }
 0x7f9   : > { %v3018_v43 = vmax.f32 %v3016_v40, 0.0  ;;  %v3019_v47 = vpack.c.bf16 %v3017_v42, %v3017_v42 }
 0x7fb   : > { %v3020_v46 = vpack.c.bf16 %v3018_v43, %v3018_v43 }
 0x7fd   : > { %3185 = vmatprep.mubr.bf16.mxu0 %v3020_v46 }
 0x7fe   : > { %3186 = vmatmul.mubr.bf16.vlgmr.msra.gmra.mxu0 %v3019_v47 }
 0x8be   : > { %v3723_v57 = vpop.f32.mrf.mxu0 }
 0x8c0   : > { %v3724_v50 = vpop.f32.mrf.mxu0 }
 0x8c1   : > { %v3725_v62 = vadd.f32 %v3724_v50, %v3723_v57 }
 0x8c2   : > { %v3726_v28 = vpop.f32.mrf.mxu0 }
 0x8c3   : > { %v3188_v45 = vadd.f32 %v3725_v62, %v3056_v24 }
 0x8c4   : > { %v3727_v36 = vpop.f32.mrf.mxu0 }
 0x8c5   : > { %3193 = vst [vmem:[%s5210_s24] sm:$0xff] %v3188_v45 }
 0x8c6   : > { %4572 = shalt.err (!%p4569_p4)
}
 0x8c7   : > { %s4573_s27 = scalar_lea.hbm %s5232_s2, 256  ;;  %s4577_s22 = scalar_lea.hbm %s5286_s10, 512 }
 0x8c8   : > { %p4574_p6 = scmp.ne.s32.totalorder %s5232_s2, %s4573_s27  ;;  %p4578_p7 = scmp.lt.s32.totalorder %s5232_s2, %s5286_s10 }
 0x8c9   : > { %p4579_p2 = scmp.lt.s32.totalorder %s4577_s22, %s4573_s27 }
 0x8ca   : > { %p4575_p12 = pnand %p4574_p6, %p5319_p10 }
 0x8cb   : > { %p4580_p9 = por %p4579_p2, %p4578_p7 }
 0x8cc   : > { %p4576_p0 = pneg %p4575_p12 }
 0x8ce   : > { %p4581_p8 = pnand %p4580_p9, %p4576_p0 }
 0x8d0   : > { %4584 = shalt.err (!%p4581_p8)
}
 0x8d1   : > { %s4653_s21 = smov 128   ;;  %s4654_s18 = smov 8  }
 0x8d2   : > { %4113 = dma.vmem_to_hbm [thread:$0]  (%p5319_p10), %s5227_s5, 256, %s5232_s2, %s3197_s3, %s4653_s21, %s4653_s21, %s4654_s18  }
 0x8d3 PF: > { %s3225_s20 = sand.u32 1, %s4623_s13   ;;  %p5320_p11 = scmp.ne.s32.totalorder %s5307_s11, 0 }
 0x8d4   : > { %p5321_p13 = scmp.ge.s32.totalorder %s4635_s16, 2  ;;  %s3226_s19 = scalar_lea.sflag [#allocation5], %s3225_s20 }
 0x8d6   : > { %p4139_p5 = pnand %p5321_p13, %p5320_p11 }
 0x8d8   : > { %p4140_p1 = pneg %p4139_p5 }
 0x8da   : > { %4618 = dma.done.wait (%p4140_p1), %s3226_s19, 256  }
 0x8db   : > { %4620 = vsyncadd (%p4140_p1), %s3226_s19, 4294967040  ;;  %p26_p3 = scmp.ge.s32.totalorder %s4831_s25, 4   ;;  %s5322_s13 = smov %s4627_s14 }
 0x8dc   : > { %s5323_s14 = smov %s4631_s15  ;;  %s5324_s15 = smov %s4842_s23 }
 0x8dd   : > { %s5325_s16 = smov %s4831_s25  ;;  %28 = sbr.rel (!%p26_p3) target bundleno = 13 (0xd), region = 140 }
 0x8e2   :  { %3231 = vsyncpa [#allocation4], 1 }
 0x8e3   :  { %3233 = vsyncpa [#allocation4 + $0x1], 1 }
 0x8e4   :  { %3234 = vsyncpa [#allocation7], 1 }
 0x8e5   :  { %3235 = vsyncpa [#allocation10], 1 }
 0x8e6   :  { %3236 = vsyncpa [#allocation13], 1 }
 0x8e7   :  { %3237 = vsyncpa [#allocation5], 1 }
 0x8e8   :  { %3239 = vsyncpa [#allocation5 + $0x1], 1 }

</bundles_post_ra>
